<compile_context>
chip_gen: v7x
topology: tpu7x:2x2x1
jax: 0.10.0
libtpu: 0.0.40
codegen_flags: <defaults>
</compile_context>

<pallas_src>
import jax
import jax.numpy as jnp
from jax.experimental import pallas as pl
from jax.experimental.pallas import tpu as pltpu


def _round_up(x, m):
    return (x + m - 1) // m * m


def _vmem_budget(nbytes):
    # Generation-aware VMEM limit: ~85% of physical (128 MiB on v5e/v6e,
    # 64 MiB on v7x) so v5e/v6e are not throttled to half their VMEM while
    # v7x keeps headroom for compiler-internal scratch.
    try:
        phys = int(pltpu.get_tpu_info().vmem_capacity_bytes)
    except Exception:
        phys = 64 * 1024 * 1024
    cap = int(phys * 0.85)
    want = 2 * int(nbytes) + (8 << 20)
    return max(min(want, cap), min(32 << 20, cap))


# --------------------------------------------------------------------------
# Kernel 1: one GRU timestep per grid iteration (serial recurrence)
# --------------------------------------------------------------------------
def decoder_step_kernel(feat_ref, hinit_ref, enc_ref,
                        w0_ref, b0_ref, w1_ref, b1_ref,
                        wcat_ref, bcat_ref,
                        cc_ref, hid_ref,
                        h0_sc, h1_sc):
    t = pl.program_id(0)
    Bp, Hp = h0_sc.shape
    f32, bf16 = jnp.float32, jnp.bfloat16

    @pl.when(t == 0)
    def _():
        h0_sc[...] = hinit_ref[0]
        h1_sc[...] = hinit_ref[1]

    h0 = h0_sc[...]
    h1 = h1_sc[...]

    def gru_cell(x_bf16, h_f32, w_ref, b_ref):
        # Single fused MXU push: [x ; h] @ W -> (Bp, 4Hp), column blocks
        # [r | z | n_input | n_hidden] sliced at 128-lane offsets (free).
        xh = jnp.concatenate([x_bf16, h_f32.astype(bf16)], axis=1)
        g = jnp.dot(xh, w_ref[...], preferred_element_type=f32) + b_ref[...]
        r = jax.nn.sigmoid(g[:, 0:Hp])
        z = jax.nn.sigmoid(g[:, Hp:2 * Hp])
        n = jnp.tanh(g[:, 2 * Hp:3 * Hp] + r * g[:, 3 * Hp:4 * Hp])
        return (1.0 - z) * n + z * h_f32

    # ---- GRU layers 0 and 1 (inter-layer dropout: eval identity) -----------
    h0n = gru_cell(feat_ref[...], h0, w0_ref, b0_ref)
    h1n = gru_cell(h0n.astype(bf16), h1, w1_ref, b1_ref)
    rnn_out = h1n                                            # (Bp, Hp) f32

    # ---- Luong "dot" attention on the VPU/XLU (no tiny M=1 MXU pushes) -----
    enc = enc_ref[...]                                       # (Bp, S, Hp) f32
    scores = jnp.sum(rnn_out[:, None, :] * enc, axis=-1)     # (Bp, S)
    m = jnp.max(scores, axis=-1, keepdims=True)
    e = jnp.exp(scores - m)
    attn = e / jnp.sum(e, axis=-1, keepdims=True)            # exact softmax
    context = jnp.sum(attn[:, :, None] * enc, axis=1)        # (Bp, Hp)

    # ---- concat Linear: one matmul on lane-concatenated [rnn_out ; context] -
    xc = jnp.concatenate([rnn_out.astype(bf16), context.astype(bf16)], axis=1)
    cc = jnp.tanh(jnp.dot(xc, wcat_ref[...], preferred_element_type=f32)
                  + bcat_ref[...])
    cc_ref[...] = cc.astype(cc_ref.dtype)                    # bf16 writeback

    # Carry hidden state; the resident output block is written back once the
    # grid finishes, giving the final hidden of both layers.
    h0_sc[...] = h0n
    h1_sc[...] = h1n
    hid_ref[0] = h0n
    hid_ref[1] = h1n


# --------------------------------------------------------------------------
# Kernel 2: vocab projection + softmax (hoisted out of the recurrence)
# --------------------------------------------------------------------------
def vocab_projection_kernel(cc_ref, wout_ref, bout_ref, out_ref):
    logits = (jnp.dot(cc_ref[...], wout_ref[...],
                      preferred_element_type=jnp.float32) + bout_ref[...])
    m = jnp.max(logits, axis=-1, keepdims=True)
    e = jnp.exp(logits - m)
    # Exact division so the returned probabilities sum to 1.
    out_ref[...] = e / jnp.sum(e, axis=-1, keepdims=True)


# --------------------------------------------------------------------------
# Wrapper: embedding gathers, padding / weight packing, two pallas_calls
# --------------------------------------------------------------------------
def decoder_forward(input_seq, speakers, init_hidden, encoder_outputs, params):
    T, B = input_seq.shape
    L, _, H = init_hidden.shape
    S = encoder_outputs.shape[0]
    V = params["w_out"].shape[0]
    E = params["embedding"].shape[1]
    P = params["personas"].shape[1]
    D_in = E + P
    assert L == 2

    # Bp multiple of 16 so bf16 (sublane-packed) row blocks stay tile aligned.
    Bp = _round_up(B, 16)
    Hp = _round_up(H, 128)
    Dp = _round_up(D_in, 128)
    Vp = _round_up(V, 128)
    f32, bf16 = jnp.float32, jnp.bfloat16

    # ---- embedding + persona concat (gathers stay in XLA) ------------------
    embedded = jnp.take(params["embedding"], input_seq, axis=0)          # (T,B,E)
    persona = jnp.take(params["personas"], speakers, axis=0)             # (B,P)
    persona = jnp.broadcast_to(persona[None], (T, B, P))                 # (T,B,P)
    features = jnp.concatenate([embedded, persona], axis=2)              # (T,B,D_in)
    # embedding_dropout / inter-layer GRU dropout: eval-mode identities.
    features = jnp.pad(features, ((0, 0), (0, Bp - B), (0, Dp - D_in)))
    features2d = features.reshape(T * Bp, Dp).astype(bf16)               # (T*Bp,Dp)

    h_init = jnp.pad(init_hidden.astype(f32),
                     ((0, 0), (0, Bp - B), (0, Hp - H)))                 # (2,Bp,Hp)
    enc_bsh = jnp.transpose(encoder_outputs.astype(f32), (1, 0, 2))      # (B,S,H)
    enc_bsh = jnp.pad(enc_bsh, ((0, Bp - B), (0, 0), (0, Hp - H)))       # (Bp,S,Hp)

    def padw(w, rows, cols):
        w = w.astype(f32)
        return jnp.pad(w, ((0, rows - w.shape[0]), (0, cols - w.shape[1])))

    def padb(b):
        return jnp.pad(b.astype(f32), (0, Hp - H))

    def pack_gru(w_ih, w_hh, b_ih, b_hh, in_rows):
        # PyTorch GRU packs gates [r, z, n] along dim 0 of (3H, in).  Fused
        # weight so [x ; h] @ W gives column blocks [r | z | n_input | n_hidden].
        wih = [padw(w_ih[g * H:(g + 1) * H].T, in_rows, Hp) for g in range(3)]
        whh = [padw(w_hh[g * H:(g + 1) * H].T, Hp, Hp) for g in range(3)]
        zi = jnp.zeros((in_rows, Hp), f32)
        zh = jnp.zeros((Hp, Hp), f32)
        top = jnp.concatenate([wih[0], wih[1], wih[2], zi], axis=1)
        bot = jnp.concatenate([whh[0], whh[1], zh, whh[2]], axis=1)
        w = jnp.concatenate([top, bot], axis=0).astype(bf16)  # (in_rows+Hp,4Hp)
        bi = [b_ih[g * H:(g + 1) * H] for g in range(3)]
        bh = [b_hh[g * H:(g + 1) * H] for g in range(3)]
        # Fold b_ih + b_hh for r/z; keep the n-gate halves separate (r gates b_hn).
        b = jnp.concatenate([padb(bi[0] + bh[0]), padb(bi[1] + bh[1]),
                             padb(bi[2]), padb(bh[2])])[None, :]          # (1,4Hp)
        return w, b

    w0, b0 = pack_gru(params["w_ih_l0"], params["w_hh_l0"],
                      params["b_ih_l0"], params["b_hh_l0"], Dp)
    w1, b1 = pack_gru(params["w_ih_l1"], params["w_hh_l1"],
                      params["b_ih_l1"], params["b_hh_l1"], Hp)

    # concat Linear packed for lane-concatenated input [rnn_out ; context].
    w_cat_t = params["w_concat"].T                                        # (2H,H)
    wcat = jnp.concatenate([padw(w_cat_t[0:H], Hp, Hp),
                            padw(w_cat_t[H:2 * H], Hp, Hp)],
                           axis=0).astype(bf16)                           # (2Hp,Hp)
    bcat = padb(params["b_concat"])[None, :]                              # (1,Hp)

    # Output projection: padded vocab columns get a huge negative bias so they
    # receive exactly zero probability after softmax.
    wout = padw(params["w_out"].T, Hp, Vp).astype(bf16)                   # (Hp,Vp)
    bout = jnp.pad(params["b_out"].astype(f32), (0, Vp - V),
                   constant_values=-1e30)[None, :]                        # (1,Vp)

    vmem_full = pl.BlockSpec(memory_space=pltpu.MemorySpace.VMEM)

    # ---- kernel 1: recurrence, grid over T (serial -> "arbitrary") ----------
    # TODO(synk): for large B on v7x add a "parallel" batch-tile grid axis
    # (each batch tile's recurrence is independent) to use both TensorCores.
    const_args = (h_init, enc_bsh, w0, b0, w1, b1, wcat, bcat)
    k1_out_shape = (jax.ShapeDtypeStruct((T * Bp, Hp), bf16),   # concat output
                    jax.ShapeDtypeStruct((L, Bp, Hp), f32))     # final hidden
    nbytes1 = (sum(a.size * a.dtype.itemsize for a in const_args)
               + 2 * Bp * Dp * 2 + 2 * Bp * Hp * 2              # streamed blocks
               + L * Bp * Hp * 4 + 2 * Bp * Hp * 4)             # hid out + carries
    cc, hidden_p = pl.pallas_call(
        decoder_step_kernel,
        out_shape=k1_out_shape,
        grid=(T,),
        in_specs=[pl.BlockSpec((Bp, Dp), lambda t: (t, 0))]
                 + [vmem_full] * len(const_args),
        out_specs=(pl.BlockSpec((Bp, Hp), lambda t: (t, 0)),
                   pl.BlockSpec((L, Bp, Hp), lambda t: (0, 0, 0))),
        scratch_shapes=[pltpu.VMEM((Bp, Hp), jnp.float32),
                        pltpu.VMEM((Bp, Hp), jnp.float32)],
        compiler_params=pltpu.CompilerParams(
            dimension_semantics=("arbitrary",),
            vmem_limit_bytes=_vmem_budget(nbytes1)),
    )(features2d, *const_args)

    # ---- kernel 2: vocab projection + softmax, parallel grid over row tiles -
    rows = T * Bp                                  # multiple of 16
    row_tile = min(256, rows)                      # >=128-class tiles when possible
    rows_p = _round_up(rows, row_tile)
    cc_p = jnp.pad(cc, ((0, rows_p - rows), (0, 0)))
    # TODO(synk): for very large vocabularies also tile Vp on a second grid
    # axis with a two-pass (running max/sum) softmax so the logits block stays
    # small; at padded-128 vocab a single lane-dense block fits easily.
    nbytes2 = (2 * row_tile * Hp * 2 + wout.size * wout.dtype.itemsize
               + bout.size * bout.dtype.itemsize + 2 * row_tile * Vp * 4)
    probs = pl.pallas_call(
        vocab_projection_kernel,
        out_shape=jax.ShapeDtypeStruct((rows_p, Vp), f32),
        grid=(rows_p // row_tile,),
        in_specs=[pl.BlockSpec((row_tile, Hp), lambda i: (i, 0)),
                  vmem_full,   # constant weight: single resident VMEM copy
                  vmem_full],  # constant bias
        out_specs=pl.BlockSpec((row_tile, Vp), lambda i: (i, 0)),
        compiler_params=pltpu.CompilerParams(
            dimension_semantics=("parallel",),
            vmem_limit_bytes=_vmem_budget(nbytes2)),
    )(cc_p, wout, bout)

    output = probs[:rows].reshape(T, Bp, Vp)[:, :B, :V]
    hidden_out = hidden_p[:, :B, :H]
    return output, hidden_out


def init_params(key, num_words, emb_dim, num_personas, persona_dim, hidden, n_layers):
    assert n_layers == 2
    ks = jax.random.split(key, 16)
    D_in = emb_dim + persona_dim
    s = 0.1

    def rnd(k, shape):
        return jax.random.normal(k, shape, jnp.float32) * s

    return {
        "embedding": rnd(ks[0], (num_words, emb_dim)),
        "personas":  rnd(ks[1], (num_personas, persona_dim)),
        # GRU layer 0 (input_size = D_in)
        "w_ih_l0": rnd(ks[2], (3 * hidden, D_in)),
        "w_hh_l0": rnd(ks[3], (3 * hidden, hidden)),
        "b_ih_l0": rnd(ks[4], (3 * hidden,)),
        "b_hh_l0": rnd(ks[5], (3 * hidden,)),
        # GRU layer 1 (input_size = hidden)
        "w_ih_l1": rnd(ks[6], (3 * hidden, hidden)),
        "w_hh_l1": rnd(ks[7], (3 * hidden, hidden)),
        "b_ih_l1": rnd(ks[8], (3 * hidden,)),
        "b_hh_l1": rnd(ks[9], (3 * hidden,)),
        # concat: Linear(2H -> H)
        "w_concat": rnd(ks[10], (hidden, 2 * hidden)),
        "b_concat": rnd(ks[11], (hidden,)),
        # out: Linear(H -> V)
        "w_out": rnd(ks[12], (num_words, hidden)),
        "b_out": rnd(ks[13], (num_words,)),
    }


if __name__ == "__main__":
    # Small, module-consistent shapes
    num_words = 64        # output_size / vocab
    emb_dim = 20
    num_personas = 6
    persona_dim = 12      # input_size = 20 + 12 = 32
    hidden = 32
    n_layers = 2
    T = 4                 # seq_length
    B = 2                 # batch
    S_enc = 10            # max_length of encoder outputs

    key = jax.random.PRNGKey(0)
    kp, k1, k2, k3, k4 = jax.random.split(key, 5)
    params = init_params(kp, num_words, emb_dim, num_personas, persona_dim,
                         hidden, n_layers)

    input_seq = jax.random.randint(k1, (T, B), 0, num_words, dtype=jnp.int32)
    speakers = jax.random.randint(k2, (B,), 0, num_personas, dtype=jnp.int32)
    init_hidden = jax.random.normal(k3, (n_layers, B, hidden), jnp.float32)
    encoder_outputs = jax.random.normal(k4, (S_enc, B, hidden), jnp.float32)

    output, hidden_out = decoder_forward(input_seq, speakers, init_hidden,
                                         encoder_outputs, params)
    output = jax.block_until_ready(output)
    hidden_out = jax.block_until_ready(hidden_out)

    assert output.shape == (T, B, num_words)
    assert hidden_out.shape == (n_layers, B, hidden)
    assert bool(jnp.all(jnp.isfinite(output))) and bool(jnp.all(jnp.isfinite(hidden_out)))
    # softmax rows must sum to 1 (exact division in the projection kernel)
    assert bool(jnp.allclose(jnp.sum(output, axis=2), 1.0, atol=1e-4))

    print("KERNEL_OK")
</pallas_src>

<mosaic_0001>
module attributes {stable_mosaic.version = 11 : i64} {
  func.func @decoder_step_kernel(%arg0: i32, %arg1: memref<16x128xbf16, #tpu.memory_space<vmem>>, %arg2: memref<2x16x128xf32, #tpu.memory_space<vmem>>, %arg3: memref<16x10x128xf32, #tpu.memory_space<vmem>>, %arg4: memref<256x512xbf16, #tpu.memory_space<vmem>>, %arg5: memref<1x512xf32, #tpu.memory_space<vmem>>, %arg6: memref<256x512xbf16, #tpu.memory_space<vmem>>, %arg7: memref<1x512xf32, #tpu.memory_space<vmem>>, %arg8: memref<256x128xbf16, #tpu.memory_space<vmem>>, %arg9: memref<1x128xf32, #tpu.memory_space<vmem>>, %arg10: memref<16x128xbf16, #tpu.memory_space<vmem>>, %arg11: memref<2x16x128xf32, #tpu.memory_space<vmem>>, %arg12: memref<16x128xf32, #tpu.memory_space<vmem>>, %arg13: memref<16x128xf32, #tpu.memory_space<vmem>>) attributes {dimension_semantics = [#tpu.dimension_semantics<arbitrary>], iteration_bounds = array<i64: 4>, scalar_prefetch = 0 : i64, scratch_operands = 2 : i64, tpu.core_type = #tpu.core_type<tc>, window_params = [{transform_indices = @transform_0, window_bounds = array<i64: 16, 128>}, {pipeline_mode = #tpu.pipeline_mode<synchronous>, transform_indices = @transform_1, window_bounds = array<i64: 2, 16, 128>}, {pipeline_mode = #tpu.pipeline_mode<synchronous>, transform_indices = @transform_2, window_bounds = array<i64: 16, 10, 128>}, {pipeline_mode = #tpu.pipeline_mode<synchronous>, transform_indices = @transform_3, window_bounds = array<i64: 256, 512>}, {pipeline_mode = #tpu.pipeline_mode<synchronous>, transform_indices = @transform_4, window_bounds = array<i64: 1, 512>}, {pipeline_mode = #tpu.pipeline_mode<synchronous>, transform_indices = @transform_5, window_bounds = array<i64: 256, 512>}, {pipeline_mode = #tpu.pipeline_mode<synchronous>, transform_indices = @transform_6, window_bounds = array<i64: 1, 512>}, {pipeline_mode = #tpu.pipeline_mode<synchronous>, transform_indices = @transform_7, window_bounds = array<i64: 256, 128>}, {pipeline_mode = #tpu.pipeline_mode<synchronous>, transform_indices = @transform_8, window_bounds = array<i64: 1, 128>}, {transform_indices = @transform_9, window_bounds = array<i64: 16, 128>}, {pipeline_mode = #tpu.pipeline_mode<synchronous>, transform_indices = @transform_10, window_bounds = array<i64: 2, 16, 128>}]} {
    %c0_i32 = arith.constant 0 : i32
    %0 = arith.cmpi eq, %arg0, %c0_i32 : i32
    %1 = arith.extui %0 : i1 to i32
    %c0_i32_0 = arith.constant 0 : i32
    %2 = arith.cmpi ne, %1, %c0_i32_0 : i32
    scf.if %2 {
      %c0_44 = arith.constant 0 : index
      %c0_45 = arith.constant 0 : index
      %c0_46 = arith.constant 0 : index
      %102 = vector.load %arg2[%c0_44, %c0_45, %c0_46] : memref<2x16x128xf32, #tpu.memory_space<vmem>>, vector<1x16x128xf32>
      %103 = vector.shape_cast %102 : vector<1x16x128xf32> to vector<16x128xf32>
      %c0_47 = arith.constant 0 : index
      %c0_48 = arith.constant 0 : index
      %104 = vector.load %arg12[%c0_47, %c0_48] : memref<16x128xf32, #tpu.memory_space<vmem>>, vector<16x128xf32>
      tpu.vector_store %arg12[%c0_47, %c0_48], %103 {strides = array<i32>} : memref<16x128xf32, #tpu.memory_space<vmem>>, vector<16x128xf32>,
      %c1_49 = arith.constant 1 : index
      %c0_50 = arith.constant 0 : index
      %c0_51 = arith.constant 0 : index
      %105 = vector.load %arg2[%c1_49, %c0_50, %c0_51] : memref<2x16x128xf32, #tpu.memory_space<vmem>>, vector<1x16x128xf32>
      %106 = vector.shape_cast %105 : vector<1x16x128xf32> to vector<16x128xf32>
      %c0_52 = arith.constant 0 : index
      %c0_53 = arith.constant 0 : index
      %107 = vector.load %arg13[%c0_52, %c0_53] : memref<16x128xf32, #tpu.memory_space<vmem>>, vector<16x128xf32>
      tpu.vector_store %arg13[%c0_52, %c0_53], %106 {strides = array<i32>} : memref<16x128xf32, #tpu.memory_space<vmem>>, vector<16x128xf32>,
    } else {
    }
    %c0 = arith.constant 0 : index
    %c0_1 = arith.constant 0 : index
    %3 = vector.load %arg12[%c0, %c0_1] : memref<16x128xf32, #tpu.memory_space<vmem>>, vector<16x128xf32>
    %c0_2 = arith.constant 0 : index
    %c0_3 = arith.constant 0 : index
    %4 = vector.load %arg13[%c0_2, %c0_3] : memref<16x128xf32, #tpu.memory_space<vmem>>, vector<16x128xf32>
    %c0_4 = arith.constant 0 : index
    %c0_5 = arith.constant 0 : index
    %5 = vector.load %arg1[%c0_4, %c0_5] : memref<16x128xbf16, #tpu.memory_space<vmem>>, vector<16x128xbf16>
    %6 = arith.truncf %3 : vector<16x128xf32> to vector<16x128xbf16>
    %7 = tpu.concatenate %5, %6 in 1 : vector<16x128xbf16>, vector<16x128xbf16> -> vector<16x256xbf16>
    %c0_6 = arith.constant 0 : index
    %c0_7 = arith.constant 0 : index
    %8 = vector.load %arg4[%c0_6, %c0_7] : memref<256x512xbf16, #tpu.memory_space<vmem>>, vector<256x512xbf16>
    %cst = arith.constant dense<0.000000e+00> : vector<16x512xf32>
    %9 = tpu.matmul %7, %8, %cst {dimension_numbers = #tpu.dot_dimension_numbers<[1], [0], [0], [1], [0, 0, 1, 1], [], []>} : vector<16x256xbf16>, vector<256x512xbf16>, vector<16x512xf32> -> vector<16x512xf32>
    %c0_8 = arith.constant 0 : index
    %c0_9 = arith.constant 0 : index
    %10 = vector.load %arg5[%c0_8, %c0_9] : memref<1x512xf32, #tpu.memory_space<vmem>>, vector<1x512xf32>
    %11 = vector.broadcast %10 : vector<1x512xf32> to vector<16x512xf32>
    %12 = arith.addf %9, %11 : vector<16x512xf32>
    %13 = vector.extract_strided_slice %12 {offsets = [0, 0], sizes = [16, 128], strides = [1, 1]} : vector<16x512xf32> to vector<16x128xf32>
    %14 = arith.negf %13 : vector<16x128xf32>
    %15 = math.exp %14 : vector<16x128xf32>
    %cst_10 = arith.constant 1.000000e+00 : f32
    %16 = vector.broadcast %cst_10 : f32 to vector<16x128xf32>
    %17 = arith.addf %16, %15 : vector<16x128xf32>
    %18 = arith.divf %16, %17 : vector<16x128xf32>
    %19 = vector.extract_strided_slice %12 {offsets = [0, 128], sizes = [16, 128], strides = [1, 1]} : vector<16x512xf32> to vector<16x128xf32>
    %20 = arith.negf %19 : vector<16x128xf32>
    %21 = math.exp %20 : vector<16x128xf32>
    %cst_11 = arith.constant 1.000000e+00 : f32
    %22 = vector.broadcast %cst_11 : f32 to vector<16x128xf32>
    %23 = arith.addf %22, %21 : vector<16x128xf32>
    %24 = arith.divf %22, %23 : vector<16x128xf32>
    %25 = vector.extract_strided_slice %12 {offsets = [0, 256], sizes = [16, 128], strides = [1, 1]} : vector<16x512xf32> to vector<16x128xf32>
    %26 = vector.extract_strided_slice %12 {offsets = [0, 384], sizes = [16, 128], strides = [1, 1]} : vector<16x512xf32> to vector<16x128xf32>
    %27 = arith.mulf %18, %26 : vector<16x128xf32>
    %28 = arith.addf %25, %27 : vector<16x128xf32>
    %29 = math.tanh %28 : vector<16x128xf32>
    %cst_12 = arith.constant 1.000000e+00 : f32
    %30 = vector.broadcast %cst_12 : f32 to vector<16x128xf32>
    %31 = arith.subf %30, %24 : vector<16x128xf32>
    %32 = arith.mulf %31, %29 : vector<16x128xf32>
    %33 = arith.mulf %24, %3 : vector<16x128xf32>
    %34 = arith.addf %32, %33 : vector<16x128xf32>
    %35 = arith.truncf %34 : vector<16x128xf32> to vector<16x128xbf16>
    %36 = arith.truncf %4 : vector<16x128xf32> to vector<16x128xbf16>
    %37 = tpu.concatenate %35, %36 in 1 : vector<16x128xbf16>, vector<16x128xbf16> -> vector<16x256xbf16>
    %c0_13 = arith.constant 0 : index
    %c0_14 = arith.constant 0 : index
    %38 = vector.load %arg6[%c0_13, %c0_14] : memref<256x512xbf16, #tpu.memory_space<vmem>>, vector<256x512xbf16>
    %cst_15 = arith.constant dense<0.000000e+00> : vector<16x512xf32>
    %39 = tpu.matmul %37, %38, %cst_15 {dimension_numbers = #tpu.dot_dimension_numbers<[1], [0], [0], [1], [0, 0, 1, 1], [], []>} : vector<16x256xbf16>, vector<256x512xbf16>, vector<16x512xf32> -> vector<16x512xf32>
    %c0_16 = arith.constant 0 : index
    %c0_17 = arith.constant 0 : index
    %40 = vector.load %arg7[%c0_16, %c0_17] : memref<1x512xf32, #tpu.memory_space<vmem>>, vector<1x512xf32>
    %41 = vector.broadcast %40 : vector<1x512xf32> to vector<16x512xf32>
    %42 = arith.addf %39, %41 : vector<16x512xf32>
    %43 = vector.extract_strided_slice %42 {offsets = [0, 0], sizes = [16, 128], strides = [1, 1]} : vector<16x512xf32> to vector<16x128xf32>
    %44 = arith.negf %43 : vector<16x128xf32>
    %45 = math.exp %44 : vector<16x128xf32>
    %cst_18 = arith.constant 1.000000e+00 : f32
    %46 = vector.broadcast %cst_18 : f32 to vector<16x128xf32>
    %47 = arith.addf %46, %45 : vector<16x128xf32>
    %48 = arith.divf %46, %47 : vector<16x128xf32>
    %49 = vector.extract_strided_slice %42 {offsets = [0, 128], sizes = [16, 128], strides = [1, 1]} : vector<16x512xf32> to vector<16x128xf32>
    %50 = arith.negf %49 : vector<16x128xf32>
    %51 = math.exp %50 : vector<16x128xf32>
    %cst_19 = arith.constant 1.000000e+00 : f32
    %52 = vector.broadcast %cst_19 : f32 to vector<16x128xf32>
    %53 = arith.addf %52, %51 : vector<16x128xf32>
    %54 = arith.divf %52, %53 : vector<16x128xf32>
    %55 = vector.extract_strided_slice %42 {offsets = [0, 256], sizes = [16, 128], strides = [1, 1]} : vector<16x512xf32> to vector<16x128xf32>
    %56 = vector.extract_strided_slice %42 {offsets = [0, 384], sizes = [16, 128], strides = [1, 1]} : vector<16x512xf32> to vector<16x128xf32>
    %57 = arith.mulf %48, %56 : vector<16x128xf32>
    %58 = arith.addf %55, %57 : vector<16x128xf32>
    %59 = math.tanh %58 : vector<16x128xf32>
    %cst_20 = arith.constant 1.000000e+00 : f32
    %60 = vector.broadcast %cst_20 : f32 to vector<16x128xf32>
    %61 = arith.subf %60, %54 : vector<16x128xf32>
    %62 = arith.mulf %61, %59 : vector<16x128xf32>
    %63 = arith.mulf %54, %4 : vector<16x128xf32>
    %64 = arith.addf %62, %63 : vector<16x128xf32>
    %c0_21 = arith.constant 0 : index
    %c0_22 = arith.constant 0 : index
    %c0_23 = arith.constant 0 : index
    %65 = vector.load %arg3[%c0_21, %c0_22, %c0_23] : memref<16x10x128xf32, #tpu.memory_space<vmem>>, vector<16x10x128xf32>
    %66 = vector.shape_cast %64 : vector<16x128xf32> to vector<16x1x128xf32>
    %67 = vector.broadcast %66 : vector<16x1x128xf32> to vector<16x10x128xf32>
    %68 = arith.mulf %67, %65 : vector<16x10x128xf32>
    %cst_24 = arith.constant dense<0.000000e+00> : vector<16x10xf32>
    %69 = vector.multi_reduction <add>, %68, %cst_24 [2] : vector<16x10x128xf32> to vector<16x10xf32>
    %cst_25 = arith.constant dense<0xFF800000> : vector<16xf32>
    %70 = vector.multi_reduction <maximumf>, %69, %cst_25 [1] : vector<16x10xf32> to vector<16xf32>
    %71 = vector.shape_cast %70 : vector<16xf32> to vector<16x1xf32>
    %72 = vector.broadcast %71 : vector<16x1xf32> to vector<16x10xf32>
    %73 = arith.subf %69, %72 : vector<16x10xf32>
    %74 = math.exp %73 : vector<16x10xf32>
    %cst_26 = arith.constant dense<0.000000e+00> : vector<16xf32>
    %75 = vector.multi_reduction <add>, %74, %cst_26 [1] : vector<16x10xf32> to vector<16xf32>
    %76 = vector.shape_cast %75 : vector<16xf32> to vector<16x1xf32>
    %77 = vector.broadcast %76 : vector<16x1xf32> to vector<16x10xf32>
    %78 = arith.divf %74, %77 : vector<16x10xf32>
    %79 = vector.shape_cast %78 : vector<16x10xf32> to vector<16x10x1xf32>
    %80 = vector.broadcast %79 : vector<16x10x1xf32> to vector<16x10x128xf32>
    %81 = arith.mulf %80, %65 : vector<16x10x128xf32>
    %cst_27 = arith.constant dense<0.000000e+00> : vector<16x128xf32>
    %82 = vector.multi_reduction <add>, %81, %cst_27 [1] : vector<16x10x128xf32> to vector<16x128xf32>
    %83 = arith.truncf %64 : vector<16x128xf32> to vector<16x128xbf16>
    %84 = arith.truncf %82 : vector<16x128xf32> to vector<16x128xbf16>
    %85 = tpu.concatenate %83, %84 in 1 : vector<16x128xbf16>, vector<16x128xbf16> -> vector<16x256xbf16>
    %c0_28 = arith.constant 0 : index
    %c0_29 = arith.constant 0 : index
    %86 = vector.load %arg8[%c0_28, %c0_29] : memref<256x128xbf16, #tpu.memory_space<vmem>>, vector<256x128xbf16>
    %cst_30 = arith.constant dense<0.000000e+00> : vector<16x128xf32>
    %87 = tpu.matmul %85, %86, %cst_30 {dimension_numbers = #tpu.dot_dimension_numbers<[1], [0], [0], [1], [0, 0, 1, 1], [], []>} : vector<16x256xbf16>, vector<256x128xbf16>, vector<16x128xf32> -> vector<16x128xf32>
    %c0_31 = arith.constant 0 : index
    %c0_32 = arith.constant 0 : index
    %88 = vector.load %arg9[%c0_31, %c0_32] : memref<1x128xf32, #tpu.memory_space<vmem>>, vector<1x128xf32>
    %89 = vector.broadcast %88 : vector<1x128xf32> to vector<16x128xf32>
    %90 = arith.addf %87, %89 : vector<16x128xf32>
    %91 = math.tanh %90 : vector<16x128xf32>
    %92 = arith.truncf %91 : vector<16x128xf32> to vector<16x128xbf16>
    %c0_33 = arith.constant 0 : index
    %c0_34 = arith.constant 0 : index
    %93 = vector.load %arg10[%c0_33, %c0_34] : memref<16x128xbf16, #tpu.memory_space<vmem>>, vector<16x128xbf16>
    tpu.vector_store %arg10[%c0_33, %c0_34], %92 {strides = array<i32>} : memref<16x128xbf16, #tpu.memory_space<vmem>>, vector<16x128xbf16>,
    %c0_35 = arith.constant 0 : index
    %c0_36 = arith.constant 0 : index
    %94 = vector.load %arg12[%c0_35, %c0_36] : memref<16x128xf32, #tpu.memory_space<vmem>>, vector<16x128xf32>
    tpu.vector_store %arg12[%c0_35, %c0_36], %34 {strides = array<i32>} : memref<16x128xf32, #tpu.memory_space<vmem>>, vector<16x128xf32>,
    %c0_37 = arith.constant 0 : index
    %c0_38 = arith.constant 0 : index
    %95 = vector.load %arg13[%c0_37, %c0_38] : memref<16x128xf32, #tpu.memory_space<vmem>>, vector<16x128xf32>
    tpu.vector_store %arg13[%c0_37, %c0_38], %64 {strides = array<i32>} : memref<16x128xf32, #tpu.memory_space<vmem>>, vector<16x128xf32>,
    %c0_39 = arith.constant 0 : index
    %c0_40 = arith.constant 0 : index
    %c0_41 = arith.constant 0 : index
    %96 = vector.load %arg11[%c0_39, %c0_40, %c0_41] : memref<2x16x128xf32, #tpu.memory_space<vmem>>, vector<1x16x128xf32>
    %97 = vector.shape_cast %96 : vector<1x16x128xf32> to vector<16x128xf32>
    %98 = vector.shape_cast %34 : vector<16x128xf32> to vector<1x16x128xf32>
    tpu.vector_store %arg11[%c0_39, %c0_40, %c0_41], %98 {strides = array<i32>} : memref<2x16x128xf32, #tpu.memory_space<vmem>>, vector<1x16x128xf32>,
    %c1 = arith.constant 1 : index
    %c0_42 = arith.constant 0 : index
    %c0_43 = arith.constant 0 : index
    %99 = vector.load %arg11[%c1, %c0_42, %c0_43] : memref<2x16x128xf32, #tpu.memory_space<vmem>>, vector<1x16x128xf32>
    %100 = vector.shape_cast %99 : vector<1x16x128xf32> to vector<16x128xf32>
    %101 = vector.shape_cast %64 : vector<16x128xf32> to vector<1x16x128xf32>
    tpu.vector_store %arg11[%c1, %c0_42, %c0_43], %101 {strides = array<i32>} : memref<2x16x128xf32, #tpu.memory_space<vmem>>, vector<1x16x128xf32>,
    return
  }
  func.func @transform_0(%arg0: i32) -> (i32, i32) {
    %c0_i32 = arith.constant 0 : i32
    %c0_i32_0 = arith.constant 0 : i32
    return %arg0, %c0_i32 : i32, i32
  }
  func.func @transform_1(%arg0: i32) -> (i32, i32, i32) {
    %c0_i32 = arith.constant 0 : i32
    %c0_i32_0 = arith.constant 0 : i32
    %c0_i32_1 = arith.constant 0 : i32
    %c0_i32_2 = arith.constant 0 : i32
    return %c0_i32, %c0_i32_0, %c0_i32_1 : i32, i32, i32
  }
  func.func @transform_2(%arg0: i32) -> (i32, i32, i32) {
    %c0_i32 = arith.constant 0 : i32
    %c0_i32_0 = arith.constant 0 : i32
    %c0_i32_1 = arith.constant 0 : i32
    %c0_i32_2 = arith.constant 0 : i32
    return %c0_i32, %c0_i32_0, %c0_i32_1 : i32, i32, i32
  }
  func.func @transform_3(%arg0: i32) -> (i32, i32) {
    %c0_i32 = arith.constant 0 : i32
    %c0_i32_0 = arith.constant 0 : i32
    %c0_i32_1 = arith.constant 0 : i32
    return %c0_i32, %c0_i32_0 : i32, i32
  }
  func.func @transform_4(%arg0: i32) -> (i32, i32) {
    %c0_i32 = arith.constant 0 : i32
    %c0_i32_0 = arith.constant 0 : i32
    %c0_i32_1 = arith.constant 0 : i32
    return %c0_i32, %c0_i32_0 : i32, i32
  }
  func.func @transform_5(%arg0: i32) -> (i32, i32) {
    %c0_i32 = arith.constant 0 : i32
    %c0_i32_0 = arith.constant 0 : i32
    %c0_i32_1 = arith.constant 0 : i32
    return %c0_i32, %c0_i32_0 : i32, i32
  }
  func.func @transform_6(%arg0: i32) -> (i32, i32) {
    %c0_i32 = arith.constant 0 : i32
    %c0_i32_0 = arith.constant 0 : i32
    %c0_i32_1 = arith.constant 0 : i32
    return %c0_i32, %c0_i32_0 : i32, i32
  }
  func.func @transform_7(%arg0: i32) -> (i32, i32) {
    %c0_i32 = arith.constant 0 : i32
    %c0_i32_0 = arith.constant 0 : i32
    %c0_i32_1 = arith.constant 0 : i32
    return %c0_i32, %c0_i32_0 : i32, i32
  }
  func.func @transform_8(%arg0: i32) -> (i32, i32) {
    %c0_i32 = arith.constant 0 : i32
    %c0_i32_0 = arith.constant 0 : i32
    %c0_i32_1 = arith.constant 0 : i32
    return %c0_i32, %c0_i32_0 : i32, i32
  }
  func.func @transform_9(%arg0: i32) -> (i32, i32) {
    %c0_i32 = arith.constant 0 : i32
    %c0_i32_0 = arith.constant 0 : i32
    return %arg0, %c0_i32 : i32, i32
  }
  func.func @transform_10(%arg0: i32) -> (i32, i32, i32) {
    %c0_i32 = arith.constant 0 : i32
    %c0_i32_0 = arith.constant 0 : i32
    %c0_i32_1 = arith.constant 0 : i32
    %c0_i32_2 = arith.constant 0 : i32
    return %c0_i32, %c0_i32_0, %c0_i32_1 : i32, i32, i32
  }
}

</mosaic_0001>

<bundles_post_ra>
// kernel: tpu_custom_call.1
= control target key start
LH: loop header
LB: loop body
LE: loop exit
PB: predicated region body
PF: predicated region fallthrough
CT: control target
= control target key end

     0   :  { %16 = vsyncpa [#allocation5], 0  ;;  %s5318_s0 = inlined_call_operand.vmem [shape: bf16[64,128], index: 0, kind: input, shape index: {}]   ;;  %s5319_s1 = inlined_call_operand.vmem [shape: f32[2,16,128], index: 1, kind: input, shape index: {}]   ;;  %s5320_s2 = inlined_call_operand.vmem [shape: f32[16,10,128], index: 2, kind: input, shape index: {}]   ;;  %s5321_s3 = inlined_call_operand.hbm [shape: bf16[256,512], index: 3, kind: input, shape index: {}]   ;;  %s5322_s4 = inlined_call_operand.vmem [shape: f32[1,512], index: 4, kind: input, shape index: {}]   ;;  %s5323_s5 = inlined_call_operand.hbm [shape: bf16[256,512], index: 5, kind: input, shape index: {}]   ;;  %s5324_s6 = inlined_call_operand.vmem [shape: f32[1,512], index: 6, kind: input, shape index: {}]   ;;  %s5325_s7 = inlined_call_operand.vmem [shape: bf16[256,128], index: 7, kind: input, shape index: {}]   ;;  %s5326_s8 = inlined_call_operand.vmem [shape: f32[1,128], index: 8, kind: input, shape index: {}]   ;;  %s5327_s9 = inlined_call_operand.hbm [shape: bf16[64,128], index: 9, kind: output, shape index: {0}]   ;;  %s5328_s10 = inlined_call_operand.hbm [shape: f32[2,16,128], index: 10, kind: output, shape index: {1}]  }
   0x1   :  { %17 = vsyncpa [#allocation8], 0 }
   0x2   :  { %18 = vsyncpa [#allocation6], 0 }
   0x3   :  { %20 = vsyncpa [#allocation6 + $0x1], 0 }
   0x4   :  { %21 = vsyncpa [#allocation11], 0  ;;  %s4210_s13 = smov 0   ;;  %s4212_s14 = smov 0  }
   0x5   :  { %s4214_s15 = smov 0   ;;  %s4216_s16 = smov 0  }
   0x6 LB: > { %5341 = sst [smem:[#allocation16_spill]] %s4137_s15  ;;  %s4231_s17 = sadd.s32 4294967295, %s4141_s16   ;;  %s4141_s16 = sphi %s4216_s16, %s5372_s16   ;;  %s4137_s15 = sphi %s4214_s15, %s5374_s15   ;;  %s4133_s14 = sphi %s4212_s14, %s5376_s14   ;;  %s4129_s13 = sphi %s4210_s13, %s5375_s13  }
   0x7   : > { %s3320_s18 = sadd.s32 4294967294, %s4141_s16   ;;  %s4235_s19 = sadd.s32 1, %s4141_s16  }
   0x8   : > { %5342 = sst [smem:[#allocation17_spill]] %s4235_s19  ;;  %s228_s20 = sadd.s32 1, %s4137_s15 }
   0x9   : > { %s225_s21 = ssub.s32 %s4141_s16, %s4235_s19  ;;  %p238_p0 = scmp.ne.s32.totalorder %s4137_s15, %s4133_s14 }
   0xa   : > { %p226_p1 = scmp.eq.s32.totalorder %s225_s21, 0  ;;  %p5329_p2 = scmp.eq.s32.totalorder %s4231_s17, 3 }
   0xb   : > { %p244_p3 = scmp.ne.s32.totalorder %s4133_s14, %s4129_s13  ;;  %p245_p4 = scmp.eq.s32.totalorder %s3320_s18, 3 }
   0xc   : > { %s4246_s22 = scalar_select %p226_p1, %s4137_s15, %s228_s20  }
   0xd   : > { %p4250_p5 = por %p5329_p2, %p238_p0  ;;  %p4254_p6 = por %p245_p4, %p244_p3 }
   0xe   : > { %5343 = sst [smem:[#allocation18_spill]] %s4246_s22  ;;  %p3321_p7 = scmp.ge.s32.totalorder %s4141_s16, 1 }
   0xf   : > { %s5344_s23 = scalar_select %p4250_p5, 1, 0 }
  0x10   : > { %s5345_s24 = scalar_select %p4254_p6, 1, 0 }
  0x11   : > { %p273_p8 = scmp.lt.s32.totalorder %s4141_s16, 5  ;;  %p5330_p10 = scmp.eq.s32.totalorder %s4231_s17, 0 }
  0x12   : > { %5346 = sst [smem:[#allocation19_spill]] %s5345_s24  ;;  %s4143_s26 = smov [#allocation4]  }
  0x13   : > { %p4262_p11 = pnand %p3321_p7, %p273_p8  ;;  %s291_s27 = sshll.u32 %s4143_s26, 4  ;;  %s292_s27 = int_to_ptr.vmem [resolvable:$true] %s291_s27 }
  0x14   : > { %s4144_s29 = smov [#allocation7]   ;;  %s3985_s18 = scalar_lea.hbm %s5321_s3, 8192 }
  0x15   : > { %s5347_s25 = scalar_select %p4262_p11, 1, 0 }
  0x16   : > { %p3541_p12 = pneg %p4262_p11  ;;  %s307_s30 = sshll.u32 %s4144_s29, 4  ;;  %s4274_s30 = int_to_ptr.vmem [resolvable:$true] %s307_s30 }
  0x17   : > { %p3986_p0 = scmp.ne.s32.totalorder %s5321_s3, %s3985_s18  ;;  %p3992_p7 = scmp.lt.u32.totalorder %s3985_s18, %s5321_s3 }
  0x18   : > { %p4270_p13 = pnand %p5330_p10, %p3541_p12 }
  0x1a   : > { %p3987_p1 = pneg %p4270_p13 }
  0x1c   : > { %p3988_p3 = pnand %p3987_p1, %p3986_p0 }
  0x1e   : > { %p3989_p4 = pneg %p3988_p3 }
  0x20   : > { %p3994_p8 = pnand %p3992_p7, %p3989_p4 }
  0x22   : > { %3997 = shalt.err (!%p3994_p8)
}
  0x23   : > { %s3998_s29 = scalar_lea.vmem %s292_s27, 8192  ;;  %p4006_p10 = scmp.lt.s32.totalorder %s292_s27, %s292_s27 }
  0x24   : > { %p3999_p12 = scmp.ne.s32.totalorder %s292_s27, %s3998_s29  ;;  %p4007_p6 = scmp.lt.s32.totalorder %s3998_s29, %s3998_s29 }
  0x26   : > { %p4001_p2 = pnand %p3999_p12, %p3987_p1  ;;  %p4008_p5 = por %p4007_p6, %p4006_p10 }
  0x28   : > { %p4002_p9 = pneg %p4001_p2 }
  0x2a   : > { %p4009_p11 = pnand %p4008_p5, %p4002_p9 }
  0x2c   : > { %4012 = shalt.err (!%p4009_p11)
}
  0x2d   : > { %s4145_s11 = smov 256   ;;  %s4146_s12 = smov 16  }
  0x2e   : > { %3544 = dma.hbm_to_vmem [thread:$0]  (!%p4270_p13), %s5321_s3, 8192, %s292_s27, [#allocation5], %s4145_s11, %s4145_s11, %s4146_s12  }
  0x2f   : > { %s4013_s26 = scalar_lea.hbm %s5323_s5, 8192 }
  0x30   : > { %p4014_p2 = scmp.ne.s32.totalorder %s5323_s5, %s4013_s26  ;;  %p4020_p9 = scmp.lt.u32.totalorder %s4013_s26, %s5323_s5 }
  0x32   : > { %p4016_p5 = pnand %p4014_p2, %p3987_p1 }
  0x34   : > { %p4017_p6 = pneg %p4016_p5 }
  0x36   : > { %p4022_p10 = pnand %p4020_p9, %p4017_p6 }
  0x38   : > { %4025 = shalt.err (!%p4022_p10)
}
  0x39   : > { %s4026_s27 = scalar_lea.vmem %s4274_s30, 8192  ;;  %p4034_p4 = scmp.lt.s32.totalorder %s4274_s30, %s4274_s30 }
  0x3a   : > { %p4027_p11 = scmp.ne.s32.totalorder %s4274_s30, %s4026_s27  ;;  %p4035_p7 = scmp.lt.s32.totalorder %s4026_s27, %s4026_s27 }
  0x3c   : > { %p4029_p0 = pnand %p4027_p11, %p3987_p1  ;;  %p4036_p8 = por %p4035_p7, %p4034_p4 }
  0x3e   : > { %p4030_p3 = pneg %p4029_p0 }
  0x40   : > { %p4037_p12 = pnand %p4036_p8, %p4030_p3 }
  0x42   : > { %4040 = shalt.err (!%p4037_p12)
}
  0x43   : > { %3547 = dma.hbm_to_vmem [thread:$0]  (!%p4270_p13), %s5323_s5, 8192, %s4274_s30, [#allocation8], %s4145_s11, %s4145_s11, %s4146_s12  }
  0x44   : > { %p5349_p2 = scmp.ne.s32.totalorder %s5347_s25, 0 }
  0x46   : > { %341 = sbr.rel (%p5349_p2) target bundleno = 1853 (0x73d), region = 56 }
  0x4d   : > { %p5350_p5 = scmp.eq.s32.totalorder %s4231_s17, 0 }
  0x4f   : > { %4112 = dma.done.wait (%p5350_p5), [#allocation5], 8192   ;;  %p5351_p1 = pmov %p5350_p5 }
  0x51   : > { %4114 = vsyncadd (%p5351_p1), [#allocation5], 4294959104  ;;  %p5352_p6 = pmov %p5351_p1 }
  0x52   : > { %p5353_p9 = pmov %p5351_p1 }
  0x53   : > { %4116 = dma.done.wait (%p5352_p6), [#allocation8], 8192  }
  0x54   : > { %4118 = vsyncadd (%p5353_p9), [#allocation8], 4294959104  ;;  %s378_s24 = sand.u32 1, %s4133_s14   ;;  %s3329_s28 = sshll.u32 %s4231_s17, 1 }
  0x55   : > { %s4337_s25 = sshll.u32 %s378_s24, 3  ;;  %p384_p13 = scmp.lt.s32.totalorder %s3329_s28, 7 }
  0x56   : > { %s380_s18 = scalar_lea.vmem [#allocation9], %s4337_s25  ;;  %p5354_p10 = scmp.ne.s32.totalorder %s4231_s17, 0 }
  0x57   : > { %s5378_s28 = smov (!%p384_p13, %s3329_s28), 7  ;;  %v395_v0 = vld [vmem:[%s5319_s1] sm:$0xff] (!%p5354_p10)  ;;  %v396_v1 = vld [vmem:[%s5319_s1 + $0x8] sm:$0xff] (!%p5354_p10)  ;;  %v3332_v2 = vld [vmem:[%s5319_s1 + $0x10] sm:$0xff] (!%p5354_p10) }
  0x58   : > { %s3330_s30 = sshll.u32 %s5378_s28, 2  ;;  %394 = sbr.rel (%p5354_p10) target bundleno = 95 (0x5f), region = 68  ;;  %397 = vst [vmem:[#allocation2] sm:$0xff] (!%p5354_p10), %v395_v0  ;;  %398 = vst [vmem:[#allocation2 + $0x8] sm:$0xff] (!%p5354_p10), %v396_v1  ;;  %v3333_v3 = vld [vmem:[%s5319_s1 + $0x18] sm:$0xff] (!%p5354_p10) }
  0x59   : > { %s4342_s22 = scalar_lea.vmem %s5318_s0, %s3330_s30  ;;  %402 = vst [vmem:[#allocation3] sm:$0xff] (!%p5354_p10), %v3332_v2  ;;  %403 = vst [vmem:[#allocation3 + $0x8] sm:$0xff] (!%p5354_p10), %v3333_v3 }
  0x5f PF: > { %v3604_v4 = vld [vmem:[#allocation4 + $0x4] ss:$16 sps:$4 sm:$0xff]   ;;  %v3606_v5 = vld [vmem:[#allocation4] ss:$16 sps:$4 sm:$0xff]   ;;  %v3622_v11 = vld [vmem:[#allocation4 + $0xc] ss:$16 sps:$4 sm:$0xff]  }
  0x60   : > { %823 = vmatprep.subr.bf16.mxu0 %v3604_v4  ;;  %v3607_v6 = vld [vmem:[#allocation4 + $0x24] ss:$16 sps:$4 sm:$0xff]   ;;  %v3609_v7 = vld [vmem:[#allocation4 + $0x20] ss:$16 sps:$4 sm:$0xff]   ;;  %v3624_v12 = vld [vmem:[#allocation4 + $0x8] ss:$16 sps:$4 sm:$0xff]   ;;  %866 = vmatprep.subr.bf16.mxu1 %v3622_v11 }
  0x61   : > { %824 = vmatpush1.bf16.msra.mxu0 %v3606_v5  ;;  %v3610_v8 = vld [vmem:[#allocation4 + $0x44] ss:$16 sps:$4 sm:$0xff]   ;;  %v3612_v9 = vld [vmem:[#allocation4 + $0x40] ss:$16 sps:$4 sm:$0xff]   ;;  %867 = vmatpush1.bf16.msra.mxu1 %v3624_v12  ;;  %v3628_v14 = vld [vmem:[#allocation4 + $0x2c] ss:$16 sps:$4 sm:$0xff]  }
  0x62   : > { %825 = vmatprep.subr.bf16.mxu0 %v3607_v6  ;;  %v3613_v10 = vld [vmem:[#allocation4 + $0x64] ss:$16 sps:$4 sm:$0xff]   ;;  %v3615_v13 = vld [vmem:[#allocation4 + $0x60] ss:$16 sps:$4 sm:$0xff]   ;;  %v3630_v15 = vld [vmem:[#allocation4 + $0x28] ss:$16 sps:$4 sm:$0xff]   ;;  %868 = vmatprep.subr.bf16.mxu1 %v3628_v14 }
  0x63   : > { %v3616_v16 = vld [vmem:[#allocation4 + $0x84] ss:$16 sps:$4 sm:$0xff]   ;;  %v3618_v17 = vld [vmem:[#allocation4 + $0x80] ss:$16 sps:$4 sm:$0xff]   ;;  %v3634_v18 = vld [vmem:[#allocation4 + $0x4c] ss:$16 sps:$4 sm:$0xff]  }
  0x64   : > { %v3619_v19 = vld [vmem:[#allocation4 + $0xa4] ss:$16 sps:$4 sm:$0xff]   ;;  %v3636_v20 = vld [vmem:[#allocation4 + $0x48] ss:$16 sps:$4 sm:$0xff]   ;;  %v3640_v21 = vld [vmem:[#allocation4 + $0x6c] ss:$16 sps:$4 sm:$0xff]  }
  0x65   : > { %826 = vmatpush1.bf16.msra.mxu0 %v3609_v7  ;;  %869 = vmatpush1.bf16.msra.mxu1 %v3630_v15  ;;  %v3621_v22 = vld [vmem:[#allocation4 + $0xa0] ss:$16 sps:$4 sm:$0xff]   ;;  %v3625_v23 = vld [vmem:[#allocation4 + $0xc4] ss:$16 sps:$4 sm:$0xff]   ;;  %v3642_v24 = vld [vmem:[#allocation4 + $0x68] ss:$16 sps:$4 sm:$0xff]  }
  0x66   : > { %827 = vmatprep.subr.bf16.mxu0 %v3610_v8  ;;  %870 = vmatprep.subr.bf16.mxu1 %v3634_v18  ;;  %v3646_v25 = vld [vmem:[#allocation4 + $0x8c] ss:$16 sps:$4 sm:$0xff]   ;;  %v3627_v26 = vld [vmem:[#allocation4 + $0xc0] ss:$16 sps:$4 sm:$0xff]   ;;  %v3631_v27 = vld [vmem:[#allocation4 + $0xe4] ss:$16 sps:$4 sm:$0xff]  }
  0x67   : > { %v3648_v28 = vld [vmem:[#allocation4 + $0x88] ss:$16 sps:$4 sm:$0xff]   ;;  %v3652_v29 = vld [vmem:[#allocation4 + $0xac] ss:$16 sps:$4 sm:$0xff]   ;;  %v3633_v30 = vld [vmem:[#allocation4 + $0xe0] ss:$16 sps:$4 sm:$0xff]  }
  0x68   : > { %v3637_v31 = vld [vmem:[#allocation4 + $0x104] ss:$16 sps:$4 sm:$0xff]   ;;  %v3654_v32 = vld [vmem:[#allocation4 + $0xa8] ss:$16 sps:$4 sm:$0xff]   ;;  %v3658_v33 = vld [vmem:[#allocation4 + $0xcc] ss:$16 sps:$4 sm:$0xff]  }
  0x69   : > { %828 = vmatpush1.bf16.msra.mxu0 %v3612_v9  ;;  %871 = vmatpush1.bf16.msra.mxu1 %v3636_v20  ;;  %v3639_v34 = vld [vmem:[#allocation4 + $0x100] ss:$16 sps:$4 sm:$0xff]   ;;  %v3643_v35 = vld [vmem:[#allocation4 + $0x124] ss:$16 sps:$4 sm:$0xff]   ;;  %v3660_v36 = vld [vmem:[#allocation4 + $0xc8] ss:$16 sps:$4 sm:$0xff]  }
  0x6a   : > { %829 = vmatprep.subr.bf16.mxu0 %v3613_v10  ;;  %872 = vmatprep.subr.bf16.mxu1 %v3640_v21  ;;  %v3664_v37 = vld [vmem:[#allocation4 + $0xec] ss:$16 sps:$4 sm:$0xff]   ;;  %v3645_v38 = vld [vmem:[#allocation4 + $0x120] ss:$16 sps:$4 sm:$0xff]   ;;  %v3649_v39 = vld [vmem:[#allocation4 + $0x144] ss:$16 sps:$4 sm:$0xff]  }
  0x6b   : > { %v3666_v40 = vld [vmem:[#allocation4 + $0xe8] ss:$16 sps:$4 sm:$0xff]   ;;  %v4359_v41 = vld [vmem:[#allocation2] sm:$0xff]  ;;  %v3670_v42 = vld [vmem:[#allocation4 + $0x10c] ss:$16 sps:$4 sm:$0xff]   ;;  %vm1725_vm0 = vcmask 1041408  }
  0x6c   : > { %v4361_v43 = vld [vmem:[#allocation2 + $0x8] sm:$0xff]  ;;  %v3651_v45 = vld [vmem:[#allocation4 + $0x140] ss:$16 sps:$4 sm:$0xff]   ;;  %v3655_v46 = vld [vmem:[#allocation4 + $0x164] ss:$16 sps:$4 sm:$0xff]   ;;  %vm1847_vm1 = vcmask 130112  }
  0x6d   : > { %830 = vmatpush1.bf16.msra.mxu0 %v3615_v13  ;;  %873 = vmatpush1.bf16.msra.mxu1 %v3642_v24  ;;  %v410_v44 = vpack.c.bf16 %v4361_v43, %v4359_v41  ;;  %v3672_v47 = vld [vmem:[#allocation4 + $0x108] ss:$16 sps:$4 sm:$0xff]   ;;  %v3676_v48 = vld [vmem:[#allocation4 + $0x12c] ss:$16 sps:$4 sm:$0xff]   ;;  %v3657_v49 = vld [vmem:[#allocation4 + $0x160] ss:$16 sps:$4 sm:$0xff]  }
  0x6e   : > { %831 = vmatprep.subr.bf16.mxu0 %v3616_v16  ;;  %874 = vmatprep.subr.bf16.mxu1 %v3646_v25  ;;  %v3661_v50 = vld [vmem:[#allocation4 + $0x184] ss:$16 sps:$4 sm:$0xff]   ;;  %v3678_v51 = vld [vmem:[#allocation4 + $0x128] ss:$16 sps:$4 sm:$0xff]   ;;  %v3682_v52 = vld [vmem:[#allocation4 + $0x14c] ss:$16 sps:$4 sm:$0xff]  }
  0x6f   : > { %855 = vmatprep.mubr.bf16.mxu0 %v410_v44  ;;  %898 = vmatprep.mubr.bf16.mxu1 %v410_v44  ;;  %v3663_v53 = vld [vmem:[#allocation4 + $0x180] ss:$16 sps:$4 sm:$0xff]   ;;  %v3667_v54 = vld [vmem:[#allocation4 + $0x1a4] ss:$16 sps:$4 sm:$0xff]   ;;  %v3684_v55 = vld [vmem:[#allocation4 + $0x148] ss:$16 sps:$4 sm:$0xff]  }
  0x70   : > { %v3686_v56 = vld [vmem:[#allocation4 + $0x16c] ss:$16 sps:$4 sm:$0xff]   ;;  %v3669_v57 = vld [vmem:[#allocation4 + $0x1a0] ss:$16 sps:$4 sm:$0xff]   ;;  %v3688_v58 = vld [vmem:[#allocation4 + $0x168] ss:$16 sps:$4 sm:$0xff]  }
  0x71   : > { %832 = vmatpush1.bf16.msra.mxu0 %v3618_v17  ;;  %875 = vmatpush1.bf16.msra.mxu1 %v3648_v28  ;;  %v3673_v59 = vld [vmem:[#allocation4 + $0x1c4] ss:$16 sps:$4 sm:$0xff]   ;;  %v3689_v60 = vld [vmem:[#allocation4 + $0x18c] ss:$16 sps:$4 sm:$0xff]   ;;  %v3675_v61 = vld [vmem:[#allocation4 + $0x1c0] ss:$16 sps:$4 sm:$0xff]  }
  0x72   : > { %833 = vmatprep.subr.bf16.mxu0 %v3619_v19  ;;  %876 = vmatprep.subr.bf16.mxu1 %v3652_v29  ;;  %v3691_v62 = vld [vmem:[#allocation4 + $0x188] ss:$16 sps:$4 sm:$0xff]   ;;  %v3679_v63 = vld [vmem:[#allocation4 + $0x1e4] ss:$16 sps:$4 sm:$0xff]   ;;  %v3692_v0 = vld [vmem:[#allocation4 + $0x1ac] ss:$16 sps:$4 sm:$0xff]  }
  0x73   : > { %v3681_v1 = vld [vmem:[#allocation4 + $0x1e0] ss:$16 sps:$4 sm:$0xff]   ;;  %v3694_v2 = vld [vmem:[#allocation4 + $0x1a8] ss:$16 sps:$4 sm:$0xff]   ;;  %v3695_v3 = vld [vmem:[#allocation4 + $0x1cc] ss:$16 sps:$4 sm:$0xff]  }
  0x74   : > { %v3703_v4 = vld [vmem:[#allocation7 + $0x4] ss:$16 sps:$4 sm:$0xff]   ;;  %v3697_v6 = vld [vmem:[#allocation4 + $0x1c8] ss:$16 sps:$4 sm:$0xff]   ;;  %v3701_v7 = vld [vmem:[#allocation7] ss:$16 sps:$4 sm:$0xff]  }
  0x75   : > { %834 = vmatpush1.bf16.msra.mxu0 %v3621_v22  ;;  %877 = vmatpush1.bf16.msra.mxu1 %v3654_v32  ;;  %v3685_v5 = vld [vmem:[%s4342_s22] sm:$0xff]   ;;  %v3698_v8 = vld [vmem:[#allocation4 + $0x1ec] ss:$16 sps:$4 sm:$0xff]   ;;  %v3700_v10 = vld [vmem:[#allocation4 + $0x1e8] ss:$16 sps:$4 sm:$0xff]   ;;  %vm1984_vm2 = vcmask 1041409  }
  0x76   : > { %835 = vmatprep.subr.bf16.mxu0 %v3625_v23  ;;  %878 = vmatprep.subr.bf16.mxu1 %v3658_v33  ;;  %v3709_v9 = vld [vmem:[#allocation7 + $0x24] ss:$16 sps:$4 sm:$0xff]   ;;  %v3707_v11 = vld [vmem:[#allocation7 + $0x20] ss:$16 sps:$4 sm:$0xff]   ;;  %v3706_v12 = vld [vmem:[#allocation7 + $0xc] ss:$16 sps:$4 sm:$0xff]  }
  0x77   : > { %v3715_v13 = vld [vmem:[#allocation7 + $0x44] ss:$16 sps:$4 sm:$0xff]   ;;  %v3704_v14 = vld [vmem:[#allocation7 + $0x8] ss:$16 sps:$4 sm:$0xff]   ;;  %v3713_v15 = vld [vmem:[#allocation7 + $0x40] ss:$16 sps:$4 sm:$0xff]  }
  0x78   : > { %v3712_v16 = vld [vmem:[#allocation7 + $0x2c] ss:$16 sps:$4 sm:$0xff]   ;;  %v3710_v17 = vld [vmem:[#allocation7 + $0x28] ss:$16 sps:$4 sm:$0xff]   ;;  %v3721_v20 = vld [vmem:[#allocation7 + $0x64] ss:$16 sps:$4 sm:$0xff]  }
  0x79   : > { %836 = vmatpush1.bf16.msra.mxu0 %v3627_v26  ;;  %879 = vmatpush1.bf16.msra.mxu1 %v3660_v36  ;;  %v3718_v18 = vld [vmem:[#allocation7 + $0x4c] ss:$16 sps:$4 sm:$0xff]   ;;  %v3716_v19 = vld [vmem:[#allocation7 + $0x48] ss:$16 sps:$4 sm:$0xff]   ;;  %v3719_v22 = vld [vmem:[#allocation7 + $0x60] ss:$16 sps:$4 sm:$0xff]  }
  0x7a   : > { %837 = vmatprep.subr.bf16.mxu0 %v3631_v27  ;;  %880 = vmatprep.subr.bf16.mxu1 %v3664_v37  ;;  %v3724_v21 = vld [vmem:[#allocation7 + $0x6c] ss:$16 sps:$4 sm:$0xff]   ;;  %v3722_v23 = vld [vmem:[#allocation7 + $0x68] ss:$16 sps:$4 sm:$0xff]   ;;  %v3727_v24 = vld [vmem:[#allocation7 + $0x84] ss:$16 sps:$4 sm:$0xff]  }
  0x7b   : > { %v3730_v25 = vld [vmem:[#allocation7 + $0x8c] ss:$16 sps:$4 sm:$0xff]   ;;  %v3725_v26 = vld [vmem:[#allocation7 + $0x80] ss:$16 sps:$4 sm:$0xff]   ;;  %v3728_v27 = vld [vmem:[#allocation7 + $0x88] ss:$16 sps:$4 sm:$0xff]  }
  0x7c   : > { %v3733_v28 = vld [vmem:[#allocation7 + $0xa4] ss:$16 sps:$4 sm:$0xff]   ;;  %v3736_v29 = vld [vmem:[#allocation7 + $0xac] ss:$16 sps:$4 sm:$0xff]   ;;  %v3749_v44 = vld [vmem:[#allocation7 + $0x100] ss:$16 sps:$4 sm:$0xff]  }
  0x7d   : > { %838 = vmatpush1.bf16.msra.mxu0 %v3633_v30  ;;  %881 = vmatpush1.bf16.msra.mxu1 %v3666_v40  ;;  %v3731_v30 = vld [vmem:[#allocation7 + $0xa0] ss:$16 sps:$4 sm:$0xff]   ;;  %v3739_v32 = vld [vmem:[#allocation7 + $0xc4] ss:$16 sps:$4 sm:$0xff]   ;;  %v3742_v33 = vld [vmem:[#allocation7 + $0xcc] ss:$16 sps:$4 sm:$0xff]  }
  0x7e   : > { %839 = vmatprep.subr.bf16.mxu0 %v3637_v31  ;;  %882 = vmatprep.subr.bf16.mxu1 %v3670_v42  ;;  %v3734_v31 = vld [vmem:[#allocation7 + $0xa8] ss:$16 sps:$4 sm:$0xff]   ;;  %v3745_v36 = vld [vmem:[#allocation7 + $0xe4] ss:$16 sps:$4 sm:$0xff]   ;;  %v3748_v37 = vld [vmem:[#allocation7 + $0xec] ss:$16 sps:$4 sm:$0xff]  }
  0x7f   : > { %v3751_v40 = vld [vmem:[#allocation7 + $0x104] ss:$16 sps:$4 sm:$0xff]   ;;  %v3754_v42 = vld [vmem:[#allocation7 + $0x10c] ss:$16 sps:$4 sm:$0xff]   ;;  %vm1986_vm3 = vcmask 1042434   ;;  %vm1988_vm4 = vcmask 1043459  }
  0x80   : > { %vm1990_vm5 = vcmask 1044484   ;;  %vm1992_vm6 = vcmask 1045509   ;;  %vm1994_vm7 = vcmask 1046534   ;;  %vm1996_vm8 = vcmask 1047559   ;;  %s4149_s27 = smov [#allocation10]   ;;  %p5364_p0 = scmp.eq.s32.totalorder %s4231_s17, 3 }
  0x81   : > { %840 = vmatpush1.bf16.msra.mxu0 %v3639_v34  ;;  %883 = vmatpush1.bf16.msra.mxu1 %v3672_v47  ;;  %v3737_v34 = vld [vmem:[#allocation7 + $0xc0] ss:$16 sps:$4 sm:$0xff]   ;;  %v3760_v47 = vld [vmem:[#allocation7 + $0x12c] ss:$16 sps:$4 sm:$0xff]   ;;  %vm2007_vm9 = vcmask 80896   ;;  %s3225_s15 = sshll.u32 %s4149_s27, 4  ;;  %s3226_s15 = int_to_ptr.vmem [resolvable:$true] %s3225_s15 }
  0x82   : > { %841 = vmatprep.subr.bf16.mxu0 %v3643_v35  ;;  %884 = vmatprep.subr.bf16.mxu1 %v3676_v48  ;;  %v3740_v35 = vld [vmem:[#allocation7 + $0xc8] ss:$16 sps:$4 sm:$0xff]   ;;  %v3755_v48 = vld [vmem:[#allocation7 + $0x120] ss:$16 sps:$4 sm:$0xff]   ;;  %s4041_s19 = scalar_lea.vmem %s3226_s15, 512  ;;  %p4048_p7 = scmp.lt.s32.totalorder %s3226_s15, %s3226_s15 }
  0x83   : > { %p4042_p11 = scmp.ne.s32.totalorder %s3226_s15, %s4041_s19  ;;  %p4049_p8 = scmp.lt.s32.totalorder %s4041_s19, %s4041_s19 }
  0x85   : > { %842 = vmatpush1.bf16.msra.mxu0 %v3645_v38  ;;  %885 = vmatpush1.bf16.msra.mxu1 %v3678_v51  ;;  %v3743_v38 = vld [vmem:[#allocation7 + $0xe0] ss:$16 sps:$4 sm:$0xff]   ;;  %v3766_v51 = vld [vmem:[#allocation7 + $0x14c] ss:$16 sps:$4 sm:$0xff]   ;;  %p4043_p3 = pnand %p4042_p11, %p5364_p0  ;;  %p4050_p12 = por %p4049_p8, %p4048_p7 }
  0x86   : > { %843 = vmatprep.subr.bf16.mxu0 %v3649_v39  ;;  %886 = vmatprep.subr.bf16.mxu1 %v3682_v52  ;;  %v3746_v39 = vld [vmem:[#allocation7 + $0xe8] ss:$16 sps:$4 sm:$0xff]   ;;  %v3761_v52 = vld [vmem:[#allocation7 + $0x140] ss:$16 sps:$4 sm:$0xff]  }
  0x87   : > { %p4044_p4 = pneg %p4043_p3 }
  0x89   : > { %844 = vmatpush1.bf16.msra.mxu0 %v3651_v45  ;;  %887 = vmatpush1.bf16.msra.mxu1 %v3684_v55  ;;  %v3752_v45 = vld [vmem:[#allocation7 + $0x108] ss:$16 sps:$4 sm:$0xff]   ;;  %v3772_v55 = vld [vmem:[#allocation7 + $0x16c] ss:$16 sps:$4 sm:$0xff]   ;;  %p4051_p2 = pnand %p4050_p12, %p4044_p4 }
  0x8a   : > { %845 = vmatprep.subr.bf16.mxu0 %v3655_v46  ;;  %888 = vmatprep.subr.bf16.mxu1 %v3686_v56  ;;  %v3757_v46 = vld [vmem:[#allocation7 + $0x124] ss:$16 sps:$4 sm:$0xff]   ;;  %v3767_v56 = vld [vmem:[#allocation7 + $0x160] ss:$16 sps:$4 sm:$0xff]  }
  0x8d   : > { %846 = vmatpush1.bf16.msra.mxu0 %v3657_v49  ;;  %889 = vmatpush1.bf16.msra.mxu1 %v3688_v58  ;;  %v3758_v49 = vld [vmem:[#allocation7 + $0x128] ss:$16 sps:$4 sm:$0xff]   ;;  %v3775_v58 = vld [vmem:[#allocation7 + $0x184] ss:$16 sps:$4 sm:$0xff]  }
  0x8e   : > { %847 = vmatprep.subr.bf16.mxu0 %v3661_v50  ;;  %890 = vmatprep.subr.bf16.mxu1 %v3689_v60  ;;  %v3763_v50 = vld [vmem:[#allocation7 + $0x144] ss:$16 sps:$4 sm:$0xff]   ;;  %v3773_v60 = vld [vmem:[#allocation7 + $0x180] ss:$16 sps:$4 sm:$0xff]  }
  0x91   : > { %848 = vmatpush1.bf16.msra.mxu0 %v3663_v53  ;;  %891 = vmatpush1.bf16.msra.mxu1 %v3691_v62  ;;  %v3764_v53 = vld [vmem:[#allocation7 + $0x148] ss:$16 sps:$4 sm:$0xff]   ;;  %v3781_v62 = vld [vmem:[#allocation7 + $0x1a4] ss:$16 sps:$4 sm:$0xff]  }
  0x92   : > { %849 = vmatprep.subr.bf16.mxu0 %v3667_v54  ;;  %892 = vmatprep.subr.bf16.mxu1 %v3692_v0  ;;  %v3769_v54 = vld [vmem:[#allocation7 + $0x164] ss:$16 sps:$4 sm:$0xff]   ;;  %v3779_v0 = vld [vmem:[#allocation7 + $0x1a0] ss:$16 sps:$4 sm:$0xff]  }
  0x95   : > { %850 = vmatpush1.bf16.msra.mxu0 %v3669_v57  ;;  %893 = vmatpush1.bf16.msra.mxu1 %v3694_v2  ;;  %v3770_v57 = vld [vmem:[#allocation7 + $0x168] ss:$16 sps:$4 sm:$0xff]   ;;  %v3787_v2 = vld [vmem:[#allocation7 + $0x1c4] ss:$16 sps:$4 sm:$0xff]  }
  0x96   : > { %851 = vmatprep.subr.bf16.mxu0 %v3673_v59  ;;  %894 = vmatprep.subr.bf16.mxu1 %v3695_v3  ;;  %v3778_v59 = vld [vmem:[#allocation7 + $0x18c] ss:$16 sps:$4 sm:$0xff]  }
  0x97   : > { %v3790_v3 = vld [vmem:[#allocation7 + $0x1cc] ss:$16 sps:$4 sm:$0xff]  }
  0x99   : > { %852 = vmatpush1.bf16.msra.mxu0 %v3675_v61  ;;  %895 = vmatpush1.bf16.msra.mxu1 %v3697_v6  ;;  %v3776_v61 = vld [vmem:[#allocation7 + $0x188] ss:$16 sps:$4 sm:$0xff]   ;;  %v3785_v6 = vld [vmem:[#allocation7 + $0x1c0] ss:$16 sps:$4 sm:$0xff]  }
  0x9a   : > { %853 = vmatprep.subr.bf16.mxu0 %v3679_v63  ;;  %896 = vmatprep.subr.bf16.mxu1 %v3698_v8  ;;  %v3784_v63 = vld [vmem:[#allocation7 + $0x1ac] ss:$16 sps:$4 sm:$0xff]  }
  0x9d   : > { %854 = vmatpush1.bf16.msra.mxu0 %v3681_v1  ;;  %897 = vmatpush1.bf16.msra.mxu1 %v3700_v10  ;;  %v3782_v1 = vld [vmem:[#allocation7 + $0x1a8] ss:$16 sps:$4 sm:$0xff]   ;;  %v3796_v10 = vld [vmem:[#allocation7 + $0x1ec] ss:$16 sps:$4 sm:$0xff]  }
  0x9e   : > { %1355 = vmatprep.subr.bf16.mxu0 %v3703_v4  ;;  %1398 = vmatprep.subr.bf16.mxu1 %v3706_v12  ;;  %v4366_v4 = vld [vmem:[#allocation3] sm:$0xff]  ;;  %v3794_v12 = vld [vmem:[#allocation7 + $0x1e8] ss:$16 sps:$4 sm:$0xff]  }
  0xa0   : > { %856 = vmatmul.mubr.bf16.vlgmr.msra.gmra.mrb[0].mxu0 %v3685_v5  ;;  %899 = vmatmul.mubr.bf16.vlgmr.msra.gmra.mrb[0].mxu1 %v3685_v5  ;;  %v4368_v5 = vld [vmem:[#allocation3 + $0x8] sm:$0xff] }
  0xa1   : > { %1356 = vmatpush1.bf16.msra.mxu0 %v3701_v7  ;;  %1399 = vmatpush1.bf16.msra.mxu1 %v3704_v14  ;;  %v3788_v7 = vld [vmem:[#allocation7 + $0x1c8] ss:$16 sps:$4 sm:$0xff]   ;;  %v948_v8 = vpack.c.bf16 %v4368_v5, %v4366_v4 }
  0xa2   : > { %1357 = vmatprep.subr.bf16.mxu0 %v3709_v9  ;;  %1400 = vmatprep.subr.bf16.mxu1 %v3712_v16  ;;  %v3793_v9 = vld [vmem:[#allocation7 + $0x1e4] ss:$16 sps:$4 sm:$0xff]   ;;  %v481_v16 = vld [vmem:[%s5322_s4] sm:$0xf] }
  0xa3   : > { %1387 = vmatprep.mubr.bf16.mxu0 %v948_v8  ;;  %1430 = vmatprep.mubr.bf16.mxu1 %v948_v8 }
  0xa5   : > { %1358 = vmatpush1.bf16.msra.mxu0 %v3707_v11  ;;  %1401 = vmatpush1.bf16.msra.mxu1 %v3710_v17  ;;  %v3791_v11 = vld [vmem:[#allocation7 + $0x1e0] ss:$16 sps:$4 sm:$0xff]  }
  0xa6   : > { %1359 = vmatprep.subr.bf16.mxu0 %v3715_v13  ;;  %1402 = vmatprep.subr.bf16.mxu1 %v3718_v18  ;;  %v483_v13 = vlaneseq }
  0xa8   : > { %v4373_v14 = vshrl.u32 %v483_v13, 7 }
  0xa9   : > { %1360 = vmatpush1.bf16.msra.mxu0 %v3713_v15  ;;  %1403 = vmatpush1.bf16.msra.mxu1 %v3716_v19 }
  0xaa   : > { %1361 = vmatprep.subr.bf16.mxu0 %v3721_v20  ;;  %1404 = vmatprep.subr.bf16.mxu1 %v3724_v21  ;;  %v4376_v15 = vsub.s32 0, %v4373_v14  ;;  %v4382_v17 = vsub.s32 1, %v4373_v14 }
  0xac   : > { %v486_v18 = vrot.slane %v481_v16, %v4376_v15  ;;  %v490_v20 = vrot.slane %v481_v16, %v4382_v17 }
  0xad   : > { %1362 = vmatpush1.bf16.msra.mxu0 %v3719_v22  ;;  %1405 = vmatpush1.bf16.msra.mxu1 %v3722_v23 }
  0xae   : > { %1363 = vmatprep.subr.bf16.mxu0 %v3727_v24  ;;  %1406 = vmatprep.subr.bf16.mxu1 %v3730_v25 }
  0xb1   : > { %1364 = vmatpush1.bf16.msra.mxu0 %v3725_v26  ;;  %1407 = vmatpush1.bf16.msra.mxu1 %v3728_v27 }
  0xb2   : > { %1365 = vmatprep.subr.bf16.mxu0 %v3733_v28  ;;  %1408 = vmatprep.subr.bf16.mxu1 %v3736_v29 }
  0xb5   : > { %1366 = vmatpush1.bf16.msra.mxu0 %v3731_v30  ;;  %1409 = vmatpush1.bf16.msra.mxu1 %v3734_v31 }
  0xb6   : > { %1367 = vmatprep.subr.bf16.mxu0 %v3739_v32  ;;  %1410 = vmatprep.subr.bf16.mxu1 %v3742_v33 }
  0xb9   : > { %1368 = vmatpush1.bf16.msra.mxu0 %v3737_v34  ;;  %1411 = vmatpush1.bf16.msra.mxu1 %v3740_v35 }
  0xba   : > { %1369 = vmatprep.subr.bf16.mxu0 %v3745_v36  ;;  %1412 = vmatprep.subr.bf16.mxu1 %v3748_v37 }
  0xbd   : > { %1370 = vmatpush1.bf16.msra.mxu0 %v3743_v38  ;;  %1413 = vmatpush1.bf16.msra.mxu1 %v3746_v39  ;;  %v4387_v39 = vsub.s32 3, %v4373_v14 }
  0xbe   : > { %1371 = vmatprep.subr.bf16.mxu0 %v3751_v40  ;;  %1414 = vmatprep.subr.bf16.mxu1 %v3754_v42  ;;  %v4390_v42 = vsub.s32 2, %v4373_v14 }
  0xc1   : > { %1372 = vmatpush1.bf16.msra.mxu0 %v3749_v44  ;;  %1415 = vmatpush1.bf16.msra.mxu1 %v3752_v45  ;;  %v498_v44 = vrot.slane %v481_v16, %v4387_v39 }
  0xc2   : > { %1373 = vmatprep.subr.bf16.mxu0 %v3757_v46  ;;  %1416 = vmatprep.subr.bf16.mxu1 %v3760_v47 }
  0xc5   : > { %1374 = vmatpush1.bf16.msra.mxu0 %v3755_v48  ;;  %1417 = vmatpush1.bf16.msra.mxu1 %v3758_v49  ;;  %v494_v48 = vrot.slane %v481_v16, %v4390_v42 }
  0xc6   : > { %1375 = vmatprep.subr.bf16.mxu0 %v3763_v50  ;;  %1418 = vmatprep.subr.bf16.mxu1 %v3766_v51 }
  0xc9   : > { %1376 = vmatpush1.bf16.msra.mxu0 %v3761_v52  ;;  %1419 = vmatpush1.bf16.msra.mxu1 %v3764_v53 }
  0xca   : > { %1377 = vmatprep.subr.bf16.mxu0 %v3769_v54  ;;  %1420 = vmatprep.subr.bf16.mxu1 %v3772_v55 }
  0xcd   : > { %1378 = vmatpush1.bf16.msra.mxu0 %v3767_v56  ;;  %1421 = vmatpush1.bf16.msra.mxu1 %v3770_v57 }
  0xce   : > { %1379 = vmatprep.subr.bf16.mxu0 %v3775_v58  ;;  %1422 = vmatprep.subr.bf16.mxu1 %v3778_v59 }
  0xd1   : > { %1380 = vmatpush1.bf16.msra.mxu0 %v3773_v60  ;;  %1423 = vmatpush1.bf16.msra.mxu1 %v3776_v61 }
  0xd2   : > { %1381 = vmatprep.subr.bf16.mxu0 %v3781_v62  ;;  %1424 = vmatprep.subr.bf16.mxu1 %v3784_v63 }
  0xd5   : > { %1382 = vmatpush1.bf16.msra.mxu0 %v3779_v0  ;;  %1425 = vmatpush1.bf16.msra.mxu1 %v3782_v1 }
  0xd6   : > { %1383 = vmatprep.subr.bf16.mxu0 %v3787_v2  ;;  %1426 = vmatprep.subr.bf16.mxu1 %v3790_v3 }
  0xd9   : > { %1384 = vmatpush1.bf16.msra.mxu0 %v3785_v6  ;;  %1427 = vmatpush1.bf16.msra.mxu1 %v3788_v7 }
  0xda   : > { %1385 = vmatprep.subr.bf16.mxu0 %v3793_v9  ;;  %1428 = vmatprep.subr.bf16.mxu1 %v3796_v10 }
  0xdd   : > { %1386 = vmatpush1.bf16.msra.mxu0 %v3791_v11  ;;  %1429 = vmatpush1.bf16.msra.mxu1 %v3794_v12  ;;  %v1013_v11 = vld [vmem:[%s5324_s6] sm:$0xf] }
  0xde   : > { %v1018_v12 = vrot.slane %v1013_v11, %v4376_v15 }
 0x173   : > { %v857_v19 = vpop.f32.mrb[0].mxu0  ;;  %v900_v31 = vpop.f32.mrb[0].mxu1 }
 0x174   : > { %v858_v21 = vadd.f32 %v857_v19, %v486_v18  ;;  %v859_v22 = vpop.f32.mrb[1].mxu0  ;;  %v902_v32 = vpop.f32.mrb[1].mxu1  ;;  %v901_v52 = vadd.f32 %v900_v31, %v494_v48 }
 0x175   : > { %v861_v23 = vpop.f32.mrb[2].mxu0  ;;  %v860_v27 = vadd.f32 %v859_v22, %v490_v20  ;;  %v904_v34 = vpop.f32.mrb[2].mxu1  ;;  %v903_v49 = vadd.f32 %v902_v32, %v498_v44 }
 0x176   : > { %v3399_v24 = vmul.f32 -1.442695, %v858_v21  ;;  %v862_v25 = vadd.f32 %v861_v23, %v486_v18  ;;  %v863_v26 = vpop.f32.mrb[3].mxu0  ;;  %v906_v35 = vpop.f32.mrb[3].mxu1  ;;  %v905_v57 = vadd.f32 %v904_v34, %v494_v48  ;;  %v1022_v18 = vrot.slane %v1013_v11, %v4382_v17 }
 0x177   : > { %v864_v29 = vadd.f32 %v863_v26, %v490_v20  ;;  %v3401_v30 = vmul.f32 -1.442695, %v860_v27  ;;  %v907_v54 = vadd.f32 %v906_v35, %v498_v44 }
 0x178   : > { %3813 = vpow2.f32 %v3399_v24  ;;  %v3400_v28 = vmul.f32 -1.442695, %v862_v25 }
 0x179   : > { %v3402_v33 = vmul.f32 -1.442695, %v864_v29 }
 0x17a   : > { %3815 = vpow2.f32 %v3400_v28 }
 0x17b   : > { %3817 = vpow2.f32 %v3401_v30 }
 0x17c   : > { %3819 = vpow2.f32 %v3402_v33 }
 0x182   : > { %v3814_v36 = vpop.eup %3813 }
 0x183   : > { %v915_v37 = vadd.f32 1.0, %v3814_v36 }
 0x184   : > { %v3816_v38 = vpop.eup %3815 }
 0x185   : > { %3821 = vrcp.f32 %v915_v37  ;;  %v916_v40 = vadd.f32 1.0, %v3816_v38  ;;  %v3818_v45 = vpop.eup %3817  ;;  %v1030_v37 = vrot.slane %v1013_v11, %v4387_v39 }
 0x186   : > { %v3820_v46 = vpop.eup %3819  ;;  %v927_v47 = vadd.f32 1.0, %v3818_v45 }
 0x187   : > { %3823 = vrcp.f32 %v916_v40  ;;  %v928_v50 = vadd.f32 1.0, %v3820_v46  ;;  %v1026_v40 = vrot.slane %v1013_v11, %v4390_v42 }
 0x188   : > { %3825 = vrcp.f32 %v927_v47 }
 0x189   : > { %3827 = vrcp.f32 %v928_v50 }
 0x18f   : > { %v3822_v51 = vpop.eup %3821 }
 0x190   : > { %v933_v53 = vmul.f32 %v3822_v51, %v903_v49 }
 0x191   : > { %v3824_v55 = vpop.eup %3823 }
 0x192   : > { %v935_v56 = vadd.f32 %v933_v53, %v901_v52  ;;  %v934_v58 = vmul.f32 %v3824_v55, %v907_v54  ;;  %v3826_v60 = vpop.eup %3825 }
 0x193   : > { %v3828_v61 = vpop.eup %3827  ;;  %v939_v62 = vsub.f32 1.0, %v3826_v60  ;;  %v943_v2 = vmul.f32 %v3826_v60, %v4359_v41 }
 0x194   : > { %3829 = vtanh.f32 %v935_v56  ;;  %v936_v59 = vadd.f32 %v934_v58, %v905_v57  ;;  %v940_v0 = vsub.f32 1.0, %v3828_v61  ;;  %v944_v7 = vmul.f32 %v3828_v61, %v4361_v43 }
 0x195   : > { %v4147_v56 = vmov 1966171168  }
 0x196   : > { %3831 = vtanh.f32 %v936_v59  ;;  %v1515_v57 = vunpack.c.l.s4 %v4147_v56 }
 0x198   : > { %v1516_v59 = vunpack.c.0.s8 %v1515_v57 }
 0x19e   : > { %v3830_v63 = vpop.eup %3829 }
 0x19f   : > { %v941_v1 = vmul.f32 %v3830_v63, %v939_v62 }
 0x1a0   : > { %v3832_v3 = vpop.eup %3831 }
 0x1a1   : > { %v942_v6 = vmul.f32 %v3832_v3, %v940_v0  ;;  %v945_v8 = vadd.f32 %v943_v2, %v941_v1  ;;  %v4405_v2 = vsub.s32 %v1516_v59, %v4373_v14  ;;  %v1498_v59 = vld [vmem:[%s5320_s2 + $0x98] sm:$0x3] }
 0x1a3   : > { %v946_v9 = vadd.f32 %v944_v7, %v942_v6  ;;  %3189 = vst [vmem:[#allocation2] sm:$0xff] %v945_v8  ;;  %3193 = vst [vmem:[#allocation10] sm:$0xff] %v945_v8 }
 0x1a5   : > { %v947_v10 = vpack.c.bf16 %v946_v9, %v945_v8  ;;  %3190 = vst [vmem:[#allocation2 + $0x8] sm:$0xff] %v946_v9  ;;  %3194 = vst [vmem:[#allocation10 + $0x8] sm:$0xff] %v946_v9 }
 0x1a7   : > { %1388 = vmatmul.mubr.bf16.vlgmr.msra.gmra.mrb[4].mxu0 %v947_v10  ;;  %1431 = vmatmul.mubr.bf16.vlgmr.msra.gmra.mrb[4].mxu1 %v947_v10 }
 0x27a   : > { %v1389_v41 = vpop.f32.mrb[4].mxu0  ;;  %v1432_v16 = vpop.f32.mrb[4].mxu1 }
 0x27b   : > { %v1390_v43 = vadd.f32 %v1389_v41, %v1018_v12  ;;  %v1391_v19 = vpop.f32.mrb[5].mxu0  ;;  %v1434_v20 = vpop.f32.mrb[5].mxu1  ;;  %v1433_v48 = vadd.f32 %v1432_v16, %v1026_v40 }
 0x27c   : > { %v1393_v21 = vpop.f32.mrb[6].mxu0  ;;  %v1436_v22 = vpop.f32.mrb[6].mxu1  ;;  %v1392_v27 = vadd.f32 %v1391_v19, %v1022_v18  ;;  %v1435_v45 = vadd.f32 %v1434_v20, %v1030_v37  ;;  %v1481_v20 = vld [vmem:[%s5320_s2 + $0x10] sm:$0xff] }
 0x27d   : > { %v3467_v23 = vmul.f32 -1.442695, %v1390_v43  ;;  %v1394_v24 = vadd.f32 %v1393_v21, %v1018_v12  ;;  %v1395_v25 = vpop.f32.mrb[7].mxu0  ;;  %v1438_v26 = vpop.f32.mrb[7].mxu1  ;;  %v1437_v53 = vadd.f32 %v1436_v22, %v1026_v40  ;;  %v1479_v12 = vld [vmem:[%s5320_s2] sm:$0xff] }
 0x27e   : > { %v1396_v29 = vadd.f32 %v1395_v25, %v1022_v18  ;;  %v3469_v30 = vmul.f32 -1.442695, %v1392_v27  ;;  %v1439_v50 = vadd.f32 %v1438_v26, %v1030_v37  ;;  %v1480_v43 = vld [vmem:[%s5320_s2 + $0x8] sm:$0x3] }
 0x27f   : > { %3833 = vpow2.f32 %v3467_v23  ;;  %v3468_v28 = vmul.f32 -1.442695, %v1394_v24  ;;  %v1482_v24 = vld [vmem:[%s5320_s2 + $0x18] sm:$0x3] }
 0x280   : > { %v3470_v31 = vmul.f32 -1.442695, %v1396_v29 }
 0x281   : > { %3835 = vpow2.f32 %v3468_v28 }
 0x282   : > { %3837 = vpow2.f32 %v3469_v30 }
 0x283   : > { %3839 = vpow2.f32 %v3470_v31  ;;  %v1496_v31 = vld [vmem:[%s5320_s2 + $0x88] sm:$0x3] }
 0x289   : > { %v3834_v32 = vpop.eup %3833 }
 0x28a   : > { %v1447_v33 = vadd.f32 1.0, %v3834_v32 }
 0x28b   : > { %v3836_v34 = vpop.eup %3835 }
 0x28c   : > { %3841 = vrcp.f32 %v1447_v33  ;;  %v1448_v35 = vadd.f32 1.0, %v3836_v34  ;;  %v3838_v36 = vpop.eup %3837  ;;  %v1495_v33 = vld [vmem:[%s5320_s2 + $0x80] sm:$0xff] }
 0x28d   : > { %v3840_v38 = vpop.eup %3839  ;;  %v1459_v44 = vadd.f32 1.0, %v3838_v36 }
 0x28e   : > { %3843 = vrcp.f32 %v1448_v35  ;;  %v1460_v46 = vadd.f32 1.0, %v3840_v38 }
 0x28f   : > { %3845 = vrcp.f32 %v1459_v44  ;;  %v1484_v44 = vld [vmem:[%s5320_s2 + $0x28] sm:$0x3] }
 0x290   : > { %3847 = vrcp.f32 %v1460_v46 }
 0x296   : > { %v3842_v47 = vpop.eup %3841 }
 0x297   : > { %v1465_v49 = vmul.f32 %v3842_v47, %v1435_v45  ;;  %v1483_v45 = vld [vmem:[%s5320_s2 + $0x20] sm:$0xff] }
 0x298   : > { %v3844_v51 = vpop.eup %3843 }
 0x299   : > { %v1467_v52 = vadd.f32 %v1465_v49, %v1433_v48  ;;  %v1466_v54 = vmul.f32 %v3844_v51, %v1439_v50  ;;  %v3846_v58 = vpop.eup %3845  ;;  %v1488_v51 = vld [vmem:[%s5320_s2 + $0x48] sm:$0x3] }
 0x29a   : > { %v3848_v60 = vpop.eup %3847  ;;  %v1471_v61 = vsub.f32 1.0, %v3846_v58  ;;  %v1475_v63 = vmul.f32 %v3846_v58, %v4366_v4 }
 0x29b   : > { %3849 = vtanh.f32 %v1467_v52  ;;  %v1468_v55 = vadd.f32 %v1466_v54, %v1437_v53  ;;  %v1472_v1 = vsub.f32 1.0, %v3848_v60  ;;  %v1476_v7 = vmul.f32 %v3848_v60, %v4368_v5  ;;  %v1487_v52 = vld [vmem:[%s5320_s2 + $0x40] sm:$0xff]  ;;  %v1497_v60 = vld [vmem:[%s5320_s2 + $0x90] sm:$0xff] }
 0x29d   : > { %3851 = vtanh.f32 %v1468_v55 }
 0x2a5   : > { %v3850_v62 = vpop.eup %3849 }
 0x2a6   : > { %v1473_v0 = vmul.f32 %v3850_v62, %v1471_v61 }
 0x2a7   : > { %v3852_v3 = vpop.eup %3851 }
 0x2a8   : > { %v4407_v6 = vadd.f32 %v1475_v63, %v1473_v0  ;;  %v1474_v8 = vmul.f32 %v3852_v3, %v1472_v1 }
 0x2aa   : > { %5355 = vst [vmem:[#allocation20_spill] sm:$0xff] %v4407_v6  ;;  %3191 = vst [vmem:[#allocation3] sm:$0xff] %v4407_v6  ;;  %v4412_v9 = vadd.f32 %v1476_v7, %v1474_v8  ;;  %v1520_v4 = vrot.slane %v4407_v6, %v4405_v2  ;;  %v1513_v19 = vcombine.high %v4407_v6, %v4407_v6  ;;  %v1500_v7 = vld [vmem:[%s5320_s2 + $0xa8] sm:$0x3]  ;;  %v1499_v8 = vld [vmem:[%s5320_s2 + $0xa0] sm:$0xff] }
 0x2ab   : > { %3196 = vst [vmem:[#allocation10 + $0x10] sm:$0xff] %v4407_v6 }
 0x2ac   : > { %5356 = vst [vmem:[#allocation21_spill] sm:$0xff] %v4412_v9  ;;  %3192 = vst [vmem:[#allocation3 + $0x8] sm:$0xff] %v4412_v9  ;;  %v1536_v10 = vrot.slane %v1520_v4, %v4405_v2  ;;  %v1528_v11 = vcombine.high %v1520_v4, %v1520_v4  ;;  %v1569_v5 = vrot.slane %v4412_v9, %v4405_v2 }
 0x2ad   : > { %3197 = vst [vmem:[#allocation10 + $0x18] sm:$0xff] %v4412_v9  ;;  %v1527_v27 = vrot.slane %v1513_v19, %v4405_v2  ;;  %v1562_v53 = vcombine.high %v4412_v9, %v4412_v9 }
 0x2ae   : > { %v1614_v16 = vrot.slane %v1536_v10, %v4376_v15  ;;  %v4428_v18 = vrot.slane %v1528_v11, %v4405_v2  ;;  %v1585_v21 = vrot.slane %v1569_v5, %v4405_v2  ;;  %v1558_v30 = vcombine.high %v1536_v10, %v1536_v10 }
 0x2af   : > { %v4454_v34 = vrot.slane %v1527_v27, %v4405_v2  ;;  %v1577_v38 = vcombine.high %v1569_v5, %v1569_v5  ;;  %v1576_v61 = vrot.slane %v1562_v53, %v4405_v2  ;;  %v1529_v4 = vcombine.high %v1527_v27, %v1527_v27 }
 0x2b0   : > { %v1691_v22 = vmul.f32 %v1614_v16, %v1479_v12  ;;  %v1618_v23 = vrot.slane %v4428_v18, %v4376_v15  ;;  %v1692_v25 = vmul.f32 %v1614_v16, %v1480_v43  ;;  %v1646_v29 = vrot.slane %v1585_v21, %v4376_v15  ;;  %v1485_v43 = vld [vmem:[%s5320_s2 + $0x30] sm:$0xff] }
 0x2b1   : > { %v1622_v37 = vrot.slane %v1558_v30, %v4376_v15  ;;  %v1630_v48 = vrot.slane %v4454_v34, %v4376_v15  ;;  %v4468_v49 = vrot.slane %v1577_v38, %v4405_v2  ;;  %v1607_v57 = vcombine.high %v1585_v21, %v1585_v21 }
 0x2b2   : > { %1723 = vadd.xlane.f32.xlu0 %v1691_v22  ;;  %v1693_v26 = vmul.f32 %v1618_v23, %v1481_v20  ;;  %v1694_v28 = vmul.f32 %v1618_v23, %v1482_v24  ;;  %v1726_v32 = vsel %vm1725_vm0, %v1692_v25, 0.0  ;;  %v1708_v36 = vmul.f32 %v1646_v29, %v1496_v31  ;;  %v1504_v24 = vld [vmem:[%s5320_s2 + $0xc8] sm:$0x3]  ;;  %v1503_v25 = vld [vmem:[%s5320_s2 + $0xc0] sm:$0xff]  ;;  %v1490_v31 = vld [vmem:[%s5320_s2 + $0x58] sm:$0x3] }
 0x2b3   : > { %v1707_v40 = vmul.f32 %v1646_v29, %v1495_v33  ;;  %v1696_v47 = vmul.f32 %v1622_v37, %v1484_v44  ;;  %v1695_v50 = vmul.f32 %v1622_v37, %v1483_v45  ;;  %v1700_v55 = vmul.f32 %v1630_v48, %v1488_v51  ;;  %v1491_v44 = vld [vmem:[%s5320_s2 + $0x60] sm:$0xff]  ;;  %v1501_v51 = vld [vmem:[%s5320_s2 + $0xb0] sm:$0xff] }
 0x2b4   : > { %1729 = vadd.xlane.f32.xlu1 %v1693_v26  ;;  %v1731_v35 = vsel %vm1725_vm0, %v1694_v28, 0.0  ;;  %v1766_v46 = vsel %vm1725_vm0, %v1708_v36, 0.0  ;;  %v1650_v56 = vrot.slane %v4468_v49, %v4376_v15  ;;  %v1699_v58 = vmul.f32 %v1630_v48, %v1487_v52 }
 0x2b5   : > { %v1736_v54 = vsel %vm1725_vm0, %v1696_v47, 0.0  ;;  %v1746_v62 = vsel %vm1725_vm0, %v1700_v55, 0.0  ;;  %v1654_v0 = vrot.slane %v1607_v57, %v4376_v15  ;;  %v1560_v1 = vcombine.high %v4428_v18, %v4428_v18  ;;  %v1486_v18 = vld [vmem:[%s5320_s2 + $0x38] sm:$0x3]  ;;  %v1505_v57 = vld [vmem:[%s5320_s2 + $0xd0] sm:$0xff] }
 0x2b6   : > { %1727 = vadd.xlane.f32.xlu0 %v1726_v32  ;;  %v1710_v63 = vmul.f32 %v1650_v56, %v1498_v59  ;;  %v1709_v3 = vmul.f32 %v1650_v56, %v1497_v60  ;;  %v1592_v12 = vrot.slane %v1576_v61, %v4405_v2  ;;  %v1557_v22 = vrot.slane %v1529_v4, %v4405_v2  ;;  %v1489_v32 = vld [vmem:[%s5320_s2 + $0x50] sm:$0xff] }
 0x2b7   : > { %v1712_v11 = vmul.f32 %v1654_v0, %v1500_v7  ;;  %v1626_v5 = vrot.slane %v1560_v1, %v4376_v15  ;;  %v1711_v16 = vmul.f32 %v1654_v0, %v1499_v8  ;;  %v1559_v29 = vcombine.high %v4454_v34, %v4454_v34  ;;  %v1507_v0 = vld [vmem:[%s5320_s2 + $0xe0] sm:$0xff] }
 0x2b8   : > { %1732 = vadd.xlane.f32.xlu1 %v1731_v35  ;;  %v1771_v10 = vsel %vm1725_vm0, %v1710_v63, 0.0  ;;  %v1662_v21 = vrot.slane %v1592_v12, %v4376_v15  ;;  %v1634_v28 = vrot.slane %v1557_v22, %v4376_v15  ;;  %v1609_v33 = vcombine.high %v4468_v49, %v4468_v49  ;;  %v1508_v63 = vld [vmem:[%s5320_s2 + $0xe8] sm:$0x3] }
 0x2b9   : > { %v1776_v19 = vsel %vm1725_vm0, %v1712_v11, 0.0  ;;  %v1698_v20 = vmul.f32 %v1626_v5, %v1486_v18  ;;  %v1697_v23 = vmul.f32 %v1626_v5, %v1485_v43  ;;  %v1638_v37 = vrot.slane %v1559_v29, %v4376_v15  ;;  %v1493_v11 = vld [vmem:[%s5320_s2 + $0x70] sm:$0xff]  ;;  %v1510_v43 = vld [vmem:[%s5320_s2 + $0xf8] sm:$0x3] }
 0x2ba   : > { %1764 = vadd.xlane.f32.xlu0 %v1707_v40  ;;  %v1716_v27 = vmul.f32 %v1662_v21, %v1504_v24  ;;  %v1715_v30 = vmul.f32 %v1662_v21, %v1503_v25  ;;  %v1702_v36 = vmul.f32 %v1634_v28, %v1490_v31  ;;  %v1578_v34 = vcombine.high %v1576_v61, %v1576_v61  ;;  %v1492_v40 = vld [vmem:[%s5320_s2 + $0x68] sm:$0x3] }
 0x2bb   : > { %v1741_v26 = vsel %vm1725_vm0, %v1698_v20, 0.0  ;;  %v1701_v38 = vmul.f32 %v1634_v28, %v1489_v32  ;;  %v1658_v47 = vrot.slane %v1609_v33, %v4376_v15  ;;  %v1703_v49 = vmul.f32 %v1638_v37, %v1491_v44 }
 0x2bc   : > { %1767 = vadd.xlane.f32.xlu1 %v1766_v46  ;;  %v1786_v35 = vsel %vm1725_vm0, %v1716_v27, 0.0  ;;  %v1751_v45 = vsel %vm1725_vm0, %v1702_v36, 0.0  ;;  %v1704_v46 = vmul.f32 %v1638_v37, %v1492_v40  ;;  %v1606_v48 = vrot.slane %v1578_v34, %v4405_v2  ;;  %v1506_v2 = vld [vmem:[%s5320_s2 + $0xd8] sm:$0x3] }
 0x2bd   : > { %v1608_v55 = vcombine.high %v1592_v12, %v1592_v12  ;;  %v1713_v56 = vmul.f32 %v1658_v47, %v1501_v51  ;;  %v1561_v61 = vcombine.high %v1557_v22, %v1557_v22 }
 0x2be   : > { %1734 = vadd.xlane.f32.xlu0 %v1695_v50  ;;  %v1502_v50 = vld [vmem:[%s5320_s2 + $0xb8] sm:$0x3]  ;;  %v1756_v52 = vsel %vm1725_vm0, %v1704_v46, 0.0  ;;  %v1610_v8 = vcombine.high %v1606_v48, %v1606_v48  ;;  %v1837_v46 = vand.u32 127, %v483_v13 }
 0x2bf   : > { %v1714_v53 = vmul.f32 %v1658_v47, %v1502_v50  ;;  %v1670_v60 = vrot.slane %v1608_v55, %v4376_v15  ;;  %v1642_v7 = vrot.slane %v1561_v61, %v4376_v15 }
 0x2c0   : > { %1737 = vadd.xlane.f32.xlu1 %v1736_v54  ;;  %v1666_v54 = vrot.slane %v1606_v48, %v4376_v15  ;;  %v1842_v48 = vadd.s32 4294967288, %v1837_v46 }
 0x2c1   : > { %v1719_v4 = vmul.f32 %v1670_v60, %v1507_v0  ;;  %v1705_v18 = vmul.f32 %v1642_v7, %v1493_v11 }
 0x2c2   : > { %1744 = vadd.xlane.f32.xlu0 %v1699_v58  ;;  %v1781_v58 = vsel %vm1725_vm0, %v1714_v53, 0.0  ;;  %v1718_v59 = vmul.f32 %v1666_v54, %v1506_v2  ;;  %v4623_v51 = vsub.s32 %v1842_v48, %v4373_v14  ;;  %v4628_v53 = vsub.s32 %v1837_v46, %v4373_v14 }
 0x2c4   : > { %1747 = vadd.xlane.f32.xlu1 %v1746_v62  ;;  %v1717_v62 = vmul.f32 %v1666_v54, %v1505_v57  ;;  %v1791_v1 = vsel %vm1725_vm0, %v1718_v59, 0.0 }
 0x2c6   : > { %1769 = vadd.xlane.f32.xlu0 %v1709_v3  ;;  %v1720_v3 = vmul.f32 %v1670_v60, %v1508_v63 }
 0x2c8   : > { %1772 = vadd.xlane.f32.xlu1 %v1771_v10  ;;  %v1494_v10 = vld [vmem:[%s5320_s2 + $0x78] sm:$0x3]  ;;  %v1796_v5 = vsel %vm1725_vm0, %v1720_v3, 0.0 }
 0x2c9   : > { %v1706_v12 = vmul.f32 %v1642_v7, %v1494_v10 }
 0x2ca   : > { %1774 = vadd.xlane.f32.xlu0 %v1711_v16  ;;  %v1674_v16 = vrot.slane %v1610_v8, %v4376_v15 }
 0x2cb   : > { %v1761_v20 = vsel %vm1725_vm0, %v1706_v12, 0.0 }
 0x2cc   : > { %1777 = vadd.xlane.f32.xlu1 %v1776_v19  ;;  %v1509_v19 = vld [vmem:[%s5320_s2 + $0xf0] sm:$0xff]  ;;  %v1722_v21 = vmul.f32 %v1674_v16, %v1510_v43 }
 0x2cd   : > { %v1721_v22 = vmul.f32 %v1674_v16, %v1509_v19 }
 0x2ce   : > { %1739 = vadd.xlane.f32.xlu0 %v1697_v23  ;;  %v1801_v23 = vsel %vm1725_vm0, %v1722_v21, 0.0 }
 0x2d0   : > { %1742 = vadd.xlane.f32.xlu1 %v1741_v26 }
 0x2d2   : > { %1784 = vadd.xlane.f32.xlu0 %v1715_v30 }
 0x2d4   : > { %1787 = vadd.xlane.f32.xlu1 %v1786_v35 }
 0x2d6   : > { %1749 = vadd.xlane.f32.xlu0 %v1701_v38 }
 0x2d8   : > { %1752 = vadd.xlane.f32.xlu1 %v1751_v45 }
 0x2da   : > { %1754 = vadd.xlane.f32.xlu0 %v1703_v49 }
 0x2dc   : > { %1757 = vadd.xlane.f32.xlu1 %v1756_v52 }
 0x2de   : > { %1779 = vadd.xlane.f32.xlu0 %v1713_v56 }
 0x2e0   : > { %1782 = vadd.xlane.f32.xlu1 %v1781_v58 }
 0x2e2   : > { %1789 = vadd.xlane.f32.xlu0 %v1717_v62 }
 0x2e4   : > { %1792 = vadd.xlane.f32.xlu1 %v1791_v1 }
 0x2e6   : > { %1794 = vadd.xlane.f32.xlu0 %v1719_v4 }
 0x2e8   : > { %1797 = vadd.xlane.f32.xlu1 %v1796_v5 }
 0x2ea   : > { %1759 = vadd.xlane.f32.xlu0 %v1705_v18 }
 0x2ec   : > { %1762 = vadd.xlane.f32.xlu1 %v1761_v20 }
 0x2ee   : > { %1799 = vadd.xlane.f32.xlu0 %v1721_v22 }
 0x2f0   : > { %1802 = vadd.xlane.f32.xlu1 %v1801_v23 }
 0x33f   : > { %v4579_v24 = vpop.xlane.xlu0 %1723 }
 0x340   : > { %v1841_v2 = vrot.slane %v4579_v24, %v4628_v53 }
 0x341   : > { %v4581_v25 = vpop.xlane.xlu1 %1729 }
 0x342   : > { %v1852_v59 = vrot.slane %v4581_v25, %v4628_v53 }
 0x343   : > { %v4583_v26 = vpop.xlane.xlu0 %1727 }
 0x344   : > { %v1846_v13 = vrot.slane %v4583_v26, %v4623_v51 }
 0x345   : > { %v4585_v27 = vpop.xlane.xlu1 %1732 }
 0x346   : > { %v1856_v56 = vrot.slane %v4585_v27, %v4623_v51  ;;  %v1848_v61 = vsel %vm1847_vm1, %v1846_v13, %v1841_v2 }
 0x347   : > { %v4587_v28 = vpop.xlane.xlu0 %1764 }
 0x348   : > { %v1857_v1 = vsel %vm1847_vm1, %v1856_v56, %v1852_v59  ;;  %v1915_v3 = vrot.slane %v4587_v28, %v4628_v53 }
 0x349   : > { %v4589_v29 = vpop.xlane.xlu1 %1767  ;;  %v1985_v20 = vsel %vm1984_vm2, %v1857_v1, %v1848_v61 }
 0x34a   : > { %v1919_v4 = vrot.slane %v4589_v29, %v4623_v51 }
 0x34b   : > { %v4591_v30 = vpop.xlane.xlu0 %1734 }
 0x34c   : > { %v1861_v62 = vrot.slane %v4591_v30, %v4628_v53 }
 0x34d   : > { %v4593_v31 = vpop.xlane.xlu1 %1737 }
 0x34e   : > { %v1865_v57 = vrot.slane %v4593_v31, %v4623_v51 }
 0x34f   : > { %v4595_v32 = vpop.xlane.xlu0 %1744 }
 0x350   : > { %v1866_v10 = vsel %vm1847_vm1, %v1865_v57, %v1861_v62  ;;  %v1879_v21 = vrot.slane %v4595_v32, %v4628_v53  ;;  %v1920_v57 = vsel %vm1847_vm1, %v1919_v4, %v1915_v3 }
 0x351   : > { %v4597_v33 = vpop.xlane.xlu1 %1747  ;;  %v1987_v48 = vsel %vm1986_vm3, %v1866_v10, %v1985_v20 }
 0x352   : > { %v1883_v11 = vrot.slane %v4597_v33, %v4623_v51 }
 0x353   : > { %v4599_v35 = vpop.xlane.xlu0 %1769 }
 0x354   : > { %v1924_v5 = vrot.slane %v4599_v35, %v4628_v53  ;;  %v1884_v59 = vsel %vm1847_vm1, %v1883_v11, %v1879_v21 }
 0x355   : > { %v4601_v36 = vpop.xlane.xlu1 %1772 }
 0x356   : > { %v1928_v63 = vrot.slane %v4601_v36, %v4623_v51 }
 0x357   : > { %v4603_v37 = vpop.xlane.xlu0 %1774 }
 0x358   : > { %v1933_v16 = vrot.slane %v4603_v37, %v4628_v53  ;;  %v1929_v22 = vsel %vm1847_vm1, %v1928_v63, %v1924_v5 }
 0x359   : > { %v4605_v34 = vpop.xlane.xlu1 %1777  ;;  %v1998_v63 = vsel %vm1984_vm2, %v1929_v22, %v1920_v57 }
 0x35a   : > { %v1937_v7 = vrot.slane %v4605_v34, %v4623_v51 }
 0x35b   : > { %v4607_v38 = vpop.xlane.xlu0 %1739 }
 0x35c   : > { %v1870_v8 = vrot.slane %v4607_v38, %v4628_v53  ;;  %v1938_v13 = vsel %vm1847_vm1, %v1937_v7, %v1933_v16 }
 0x35d   : > { %v4609_v40 = vpop.xlane.xlu1 %1742  ;;  %v1999_v3 = vsel %vm1986_vm3, %v1938_v13, %v1998_v63 }
 0x35e   : > { %v1874_v60 = vrot.slane %v4609_v40, %v4623_v51 }
 0x35f   : > { %v4611_v44 = vpop.xlane.xlu0 %1784 }
 0x360   : > { %v1875_v18 = vsel %vm1847_vm1, %v1874_v60, %v1870_v8  ;;  %v1951_v20 = vrot.slane %v4611_v44, %v4628_v53 }
 0x361   : > { %v4613_v45 = vpop.xlane.xlu1 %1787  ;;  %v1989_v60 = vsel %vm1988_vm4, %v1875_v18, %v1987_v48 }
 0x362   : > { %v1955_v4 = vrot.slane %v4613_v45, %v4623_v51 }
 0x363   : > { %v4616_v47 = vpop.xlane.xlu0 %1749 }
 0x364   : > { %v1888_v56 = vrot.slane %v4616_v47, %v4628_v53  ;;  %v1956_v57 = vsel %vm1847_vm1, %v1955_v4, %v1951_v20 }
 0x365   : > { %v4618_v49 = vpop.xlane.xlu1 %1752 }
 0x366   : > { %v1892_v43 = vrot.slane %v4618_v49, %v4623_v51 }
 0x367   : > { %v4620_v50 = vpop.xlane.xlu0 %1754 }
 0x368   : > { %v1897_v61 = vrot.slane %v4620_v50, %v4628_v53  ;;  %v1893_v1 = vsel %vm1847_vm1, %v1892_v43, %v1888_v56 }
 0x369   : > { %v4625_v52 = vpop.xlane.xlu1 %1757 }
 0x36a   : > { %v1901_v23 = vrot.slane %v4625_v52, %v4623_v51 }
 0x36b   : > { %v4630_v54 = vpop.xlane.xlu0 %1779 }
 0x36c   : > { %v1942_v2 = vrot.slane %v4630_v54, %v4628_v53  ;;  %v1902_v5 = vsel %vm1847_vm1, %v1901_v23, %v1897_v61 }
 0x36d   : > { %v4634_v55 = vpop.xlane.xlu1 %1782 }
 0x36e   : > { %v1946_v19 = vrot.slane %v4634_v55, %v4623_v51 }
 0x36f   : > { %v4642_v58 = vpop.xlane.xlu0 %1789 }
 0x370   : > { %v1947_v7 = vsel %vm1847_vm1, %v1946_v19, %v1942_v2  ;;  %v1960_v16 = vrot.slane %v4642_v58, %v4628_v53  ;;  %v1991_v19 = vsel %vm1990_vm5, %v1884_v59, %v1989_v60 }
 0x371   : > { %v4653_v0 = vpop.xlane.xlu1 %1792  ;;  %v2000_v21 = vsel %vm1988_vm4, %v1947_v7, %v1999_v3  ;;  %v1993_v48 = vsel %vm1992_vm6, %v1893_v1, %v1991_v19 }
 0x372   : > { %v1964_v8 = vrot.slane %v4653_v0, %v4623_v51  ;;  %v1995_v2 = vsel %vm1994_vm7, %v1902_v5, %v1993_v48 }
 0x373   : > { %v4669_v12 = vpop.xlane.xlu0 %1794 }
 0x374   : > { %v1969_v22 = vrot.slane %v4669_v12, %v4628_v53  ;;  %v1965_v13 = vsel %vm1847_vm1, %v1964_v8, %v1960_v16  ;;  %v2001_v8 = vsel %vm1990_vm5, %v1956_v57, %v2000_v21 }
 0x375   : > { %v4684_v46 = vpop.xlane.xlu1 %1797  ;;  %v2002_v3 = vsel %vm1992_vm6, %v1965_v13, %v2001_v8  ;;  %v4764_v8 = vsub.s32 6, %v4373_v14 }
 0x376   : > { %v1973_v10 = vrot.slane %v4684_v46, %v4623_v51 }
 0x377   : > { %v4697_v62 = vpop.xlane.xlu0 %1759 }
 0x378   : > { %v1906_v18 = vrot.slane %v4697_v62, %v4628_v53  ;;  %v1974_v61 = vsel %vm1847_vm1, %v1973_v10, %v1969_v22 }
 0x379   : > { %v4709_v11 = vpop.xlane.xlu1 %1762  ;;  %v2003_v5 = vsel %vm1994_vm7, %v1974_v61, %v2002_v3 }
 0x37a   : > { %v1910_v43 = vrot.slane %v4709_v11, %v4623_v51 }
 0x37b   : > { %v4724_v23 = vpop.xlane.xlu0 %1799 }
 0x37c   : > { %v1911_v56 = vsel %vm1847_vm1, %v1910_v43, %v1906_v18  ;;  %v1978_v63 = vrot.slane %v4724_v23, %v4628_v53  ;;  %v4148_v18 = vmov 0  }
 0x37d   : > { %v4731_v59 = vpop.xlane.xlu1 %1802  ;;  %v1997_v60 = vsel %vm1996_vm8, %v1911_v56, %v1995_v2  ;;  %3603 = vset.pattern.permute.xlu1 %v4148_v18  ;;  %3602 = vset.pattern.permute.xlu0 %v4148_v18  ;;  %v4753_v56 = vsub.s32 4, %v4373_v14 }
 0x37e   : > { %v1982_v1 = vrot.slane %v4731_v59, %v4623_v51  ;;  %v2008_v7 = vsel %vm2007_vm9, %v1997_v60, -inf }
 0x37f   : > { %2009 = vmax.xlane.f32.xlu0 %v2008_v7 }
 0x380   : > { %v1983_v4 = vsel %vm1847_vm1, %v1982_v1, %v1978_v63  ;;  %v4758_v63 = vsub.s32 5, %v4373_v14 }
 0x381   : > { %v2004_v16 = vsel %vm1996_vm8, %v1983_v4, %v2003_v5 }
 0x382   : > { %v2011_v10 = vsel %vm2007_vm9, %v2004_v16, -inf  ;;  %v4770_v16 = vsub.s32 7, %v4373_v14 }
 0x383   : > { %2012 = vmax.xlane.f32.xlu1 %v2011_v10 }
 0x40c   : > { %v2010_v43 = vpop.xlane.xlu0 %2009 }
 0x40d   : > { %v2019_v19 = vrot.slane %v2010_v43, %v4376_v15  ;;  %v2023_v20 = vrot.slane %v2010_v43, %v4382_v17  ;;  %v2027_v21 = vrot.slane %v2010_v43, %v4390_v42  ;;  %v2031_v2 = vrot.slane %v2010_v43, %v4387_v39 }
 0x40e   : > { %v2039_v4 = vrot.slane %v2010_v43, %v4758_v63  ;;  %v2043_v18 = vrot.slane %v2010_v43, %v4764_v8 }
 0x40f   : > { %v2096_v22 = vsub.f32 %v4579_v24, %v2019_v19  ;;  %v2097_v48 = vsub.f32 %v4583_v26, %v2019_v19  ;;  %v2098_v13 = vsub.f32 %v4581_v25, %v2023_v20  ;;  %v2101_v57 = vsub.f32 %v4593_v31, %v2027_v21 }
 0x410   : > { %v2099_v1 = vsub.f32 %v4585_v27, %v2023_v20  ;;  %v2035_v26 = vrot.slane %v2010_v43, %v4753_v56  ;;  %v2103_v25 = vsub.f32 %v4609_v40, %v2031_v2  ;;  %v2100_v31 = vsub.f32 %v4591_v30, %v2027_v21 }
 0x411   : > { %v2128_v60 = vmul.f32 1.442695, %v2096_v22  ;;  %v2130_v61 = vmul.f32 1.442695, %v2097_v48  ;;  %v2132_v24 = vmul.f32 1.442695, %v2098_v13  ;;  %v2102_v40 = vsub.f32 %v4607_v38, %v2031_v2  ;;  %v4786_v13 = vpop.xlane.xlu1 %2012 }
 0x412   : > { %v2138_v7 = vmul.f32 1.442695, %v2101_v57  ;;  %v2134_v3 = vmul.f32 1.442695, %v2099_v1  ;;  %v2105_v5 = vsub.f32 %v4597_v33, %v2035_v26  ;;  %v2142_v27 = vmul.f32 1.442695, %v2103_v25 }
 0x413   : > { %3853 = vpow2.f32 %v2128_v60  ;;  %v2136_v10 = vmul.f32 1.442695, %v2100_v31  ;;  %v2107_v19 = vsub.f32 %v4618_v49, %v2039_v4  ;;  %v2104_v33 = vsub.f32 %v4595_v32, %v2035_v26 }
 0x414   : > { %3855 = vpow2.f32 %v2130_v61  ;;  %v2146_v30 = vmul.f32 1.442695, %v2105_v5  ;;  %v2140_v14 = vmul.f32 1.442695, %v2102_v40  ;;  %v2047_v38 = vrot.slane %v2010_v43, %v4770_v16 }
 0x415   : > { %3857 = vpow2.f32 %v2132_v24  ;;  %v2109_v22 = vsub.f32 %v4625_v52, %v2043_v18  ;;  %v2150_v49 = vmul.f32 1.442695, %v2107_v19  ;;  %v2106_v57 = vsub.f32 %v4616_v47, %v2039_v4 }
 0x416   : > { %3859 = vpow2.f32 %v2138_v7  ;;  %v2144_v32 = vmul.f32 1.442695, %v2104_v33  ;;  %v2111_v43 = vsub.f32 %v4709_v11, %v2047_v38  ;;  %v4796_v60 = vrot.slane %v4786_v13, %v4390_v42 }
 0x417   : > { %3861 = vpow2.f32 %v2134_v3  ;;  %v2154_v52 = vmul.f32 1.442695, %v2109_v22  ;;  %v2108_v47 = vsub.f32 %v4620_v50, %v2043_v18  ;;  %v2148_v24 = vmul.f32 1.442695, %v2106_v57 }
 0x418   : > { %3863 = vpow2.f32 %v2142_v27  ;;  %v2158_v11 = vmul.f32 1.442695, %v2111_v43  ;;  %v4807_v26 = vrot.slane %v4786_v13, %v4387_v39  ;;  %v2117_v25 = vsub.f32 %v4605_v34, %v4796_v60 }
 0x419   : > { %3865 = vpow2.f32 %v2136_v10  ;;  %v2110_v50 = vsub.f32 %v4697_v62, %v2047_v38  ;;  %v2152_v3 = vmul.f32 1.442695, %v2108_v47  ;;  %v2051_v4 = vrot.slane %v4786_v13, %v4376_v15 }
 0x41a   : > { %3867 = vpow2.f32 %v2146_v30  ;;  %v4822_v5 = vrot.slane %v4786_v13, %v4753_v56  ;;  %v2119_v34 = vsub.f32 %v4634_v55, %v4807_v26  ;;  %v2170_v27 = vmul.f32 1.442695, %v2117_v25 }
 0x41b   : > { %3869 = vpow2.f32 %v2140_v14  ;;  %v2156_v10 = vmul.f32 1.442695, %v2110_v50  ;;  %v2112_v18 = vsub.f32 %v4587_v28, %v2051_v4  ;;  %v4835_v19 = vrot.slane %v4786_v13, %v4758_v63 }
 0x41c   : > { %3871 = vpow2.f32 %v2150_v49  ;;  %v2121_v55 = vsub.f32 %v4613_v45, %v4822_v5  ;;  %v2174_v30 = vmul.f32 1.442695, %v2119_v34  ;;  %v2055_v28 = vrot.slane %v4786_v13, %v4382_v17 }
 0x41d   : > { %v4775_v20 = vpop.eup %3853  ;;  %3873 = vpow2.f32 %v2144_v32  ;;  %v2113_v38 = vsub.f32 %v4589_v29, %v2051_v4  ;;  %v2160_v22 = vmul.f32 1.442695, %v2112_v18  ;;  %v4850_v45 = vrot.slane %v4786_v13, %v4764_v8 }
 0x41e   : > { %v4777_v21 = vpop.eup %3855  ;;  %2225 = vperm.xlu0 %3602, %v4775_v20   ;;  %3875 = vpow2.f32 %v2154_v52  ;;  %v2123_v49 = vsub.f32 %v4653_v0, %v4835_v19  ;;  %v2178_v57 = vmul.f32 1.442695, %v2121_v55  ;;  %v2114_v29 = vsub.f32 %v4599_v35, %v2055_v28 }
 0x41f   : > { %2228 = vperm.xlu1 %3603, %v4777_v21   ;;  %v4784_v48 = vpop.eup %3857  ;;  %3877 = vpow2.f32 %v2148_v24  ;;  %v2162_v52 = vmul.f32 1.442695, %v2113_v38  ;;  %v2079_v47 = vrot.slane %v4786_v13, %v4770_v16  ;;  %v2125_v0 = vsub.f32 %v4684_v46, %v4850_v45 }
 0x420   : > { %v4788_v2 = vpop.eup %3859  ;;  %3879 = vpow2.f32 %v2158_v11  ;;  %v2182_v24 = vmul.f32 1.442695, %v2123_v49  ;;  %v2115_v35 = vsub.f32 %v4601_v36, %v2055_v28  ;;  %v2164_v50 = vmul.f32 1.442695, %v2114_v29 }
 0x421   : > { %v4798_v61 = vpop.eup %3861  ;;  %3881 = vpow2.f32 %v2152_v3  ;;  %v2127_v3 = vsub.f32 %v4731_v59, %v2079_v47  ;;  %v2186_v13 = vmul.f32 1.442695, %v2125_v0  ;;  %v2116_v36 = vsub.f32 %v4603_v37, %v4796_v60 }
 0x422   : > { %2240 = vperm.xlu0 %3602, %v4788_v2   ;;  %v4800_v1 = vpop.eup %3863  ;;  %3883 = vpow2.f32 %v2170_v27  ;;  %v2166_v34 = vmul.f32 1.442695, %v2115_v35  ;;  %v2118_v18 = vsub.f32 %v4630_v54, %v4807_v26  ;;  %v2120_v37 = vsub.f32 %v4611_v44, %v4822_v5 }
 0x423   : > { %2231 = vperm.xlu1 %3603, %v4784_v48   ;;  %v4811_v7 = vpop.eup %3865  ;;  %3885 = vpow2.f32 %v2156_v10  ;;  %v2190_v27 = vmul.f32 1.442695, %v2127_v3  ;;  %v2168_v55 = vmul.f32 1.442695, %v2116_v36  ;;  %v2122_v54 = vsub.f32 %v4642_v58, %v4835_v19 }
 0x424   : > { %v4813_v31 = vpop.eup %3867  ;;  %3887 = vpow2.f32 %v2174_v30  ;;  %v2172_v60 = vmul.f32 1.442695, %v2118_v18  ;;  %v2176_v26 = vmul.f32 1.442695, %v2120_v37  ;;  %v2124_v44 = vsub.f32 %v4669_v12, %v4850_v45 }
 0x425   : > { %v4826_v40 = vpop.eup %3869  ;;  %3889 = vpow2.f32 %v2160_v22  ;;  %v2180_v5 = vmul.f32 1.442695, %v2122_v54  ;;  %v2126_v58 = vsub.f32 %v4724_v23, %v2079_v47 }
 0x426   : > { %2246 = vperm.xlu0 %3602, %v4800_v1   ;;  %v4828_v62 = vpop.eup %3871  ;;  %3891 = vpow2.f32 %v2178_v57  ;;  %v2184_v19 = vmul.f32 1.442695, %v2124_v44 }
 0x427   : > { %2234 = vperm.xlu1 %3603, %v4798_v61   ;;  %v4839_v33 = vpop.eup %3873  ;;  %3893 = vpow2.f32 %v2162_v52  ;;  %v2188_v0 = vmul.f32 1.442695, %v2126_v58 }
 0x428   : > { %v4841_v14 = vpop.eup %3875  ;;  %3895 = vpow2.f32 %v2182_v24 }
 0x429   : > { %v4854_v32 = vpop.eup %3877  ;;  %3897 = vpow2.f32 %v2164_v50 }
 0x42a   : > { %2252 = vperm.xlu0 %3602, %v4813_v31   ;;  %v4856_v43 = vpop.eup %3879  ;;  %3899 = vpow2.f32 %v2186_v13 }
 0x42b   : > { %2237 = vperm.xlu1 %3603, %v4811_v7   ;;  %v4865_v11 = vpop.eup %3881  ;;  %3901 = vpow2.f32 %v2166_v34 }
 0x42c   : > { %v4867_v25 = vpop.eup %3883  ;;  %3903 = vpow2.f32 %v2190_v27 }
 0x42d   : > { %v4873_v4 = vpop.eup %3885  ;;  %3905 = vpow2.f32 %v2168_v55 }
 0x42e   : > { %2258 = vperm.xlu0 %3602, %v4828_v62   ;;  %5357 = vst [vmem:[#allocation22_spill] sm:$0xff] %v4873_v4  ;;  %v4875_v46 = vpop.eup %3887  ;;  %3907 = vpow2.f32 %v2172_v60 }
 0x42f   : > { %2243 = vperm.xlu1 %3603, %v4826_v40   ;;  %v4881_v10 = vpop.eup %3889  ;;  %3909 = vpow2.f32 %v2176_v26 }
 0x430   : > { %v4883_v59 = vpop.eup %3891  ;;  %3911 = vpow2.f32 %v2180_v5 }
 0x431   : > { %v4889_v30 = vpop.eup %3893  ;;  %3913 = vpow2.f32 %v2184_v19 }
 0x432   : > { %2264 = vperm.xlu0 %3602, %v4841_v14   ;;  %v4891_v28 = vpop.eup %3895  ;;  %3915 = vpow2.f32 %v2188_v0 }
 0x433   : > { %2249 = vperm.xlu1 %3603, %v4839_v33   ;;  %v4897_v38 = vpop.eup %3897 }
 0x434   : > { %v4899_v22 = vpop.eup %3899 }
 0x435   : > { %v4905_v49 = vpop.eup %3901 }
 0x436   : > { %2270 = vperm.xlu0 %3602, %v4856_v43   ;;  %v4907_v57 = vpop.eup %3903 }
 0x437   : > { %2255 = vperm.xlu1 %3603, %v4854_v32   ;;  %v4913_v29 = vpop.eup %3905 }
 0x438   : > { %v4917_v52 = vpop.eup %3907 }
 0x439   : > { %v4920_v24 = vpop.eup %3909 }
 0x43a   : > { %2288 = vperm.xlu0 %3602, %v4867_v25   ;;  %v4923_v12 = vpop.eup %3911 }
 0x43b   : > { %2261 = vperm.xlu1 %3603, %v4865_v11   ;;  %v4926_v45 = vpop.eup %3913 }
 0x43c   : > { %v4929_v23 = vpop.eup %3915 }
 0x43d   : > { %5358 = vst [vmem:[#allocation23_spill] sm:$0xff] %v4929_v23 }
 0x43e   : > { %2294 = vperm.xlu0 %3602, %v4875_v46  }
 0x43f   : > { %2267 = vperm.xlu1 %3603, %v4873_v4  }
 0x442   : > { %2300 = vperm.xlu0 %3602, %v4883_v59  }
 0x443   : > { %2273 = vperm.xlu1 %3603, %v4881_v10  }
 0x446   : > { %2306 = vperm.xlu0 %3602, %v4891_v28  }
 0x447   : > { %2276 = vperm.xlu1 %3603, %v4889_v30  }
 0x44a   : > { %2312 = vperm.xlu0 %3602, %v4899_v22  }
 0x44b   : > { %2279 = vperm.xlu1 %3603, %v4897_v38  }
 0x44e   : > { %2318 = vperm.xlu0 %3602, %v4907_v57  }
 0x44f   : > { %2282 = vperm.xlu1 %3603, %v4905_v49  }
 0x453   : > { %2285 = vperm.xlu1 %3603, %v4913_v29  }
 0x457   : > { %2291 = vperm.xlu1 %3603, %v4917_v52  }
 0x45b   : > { %2297 = vperm.xlu1 %3603, %v4920_v24  }
 0x45f   : > { %2303 = vperm.xlu1 %3603, %v4923_v12  }
 0x463   : > { %2309 = vperm.xlu1 %3603, %v4926_v45  }
 0x467   : > { %2315 = vperm.xlu1 %3603, %v4929_v23  }
 0x49d   : > { %v2226_v47 = vpop.permute.xlu0 %2225 }
 0x49e   : > { %v2229_v35 = vpop.permute.xlu1 %2228  ;;  %v2323_v58 = vrot.slane %v2226_v47, %v4628_v53 }
 0x49f   : > { %v2327_v5 = vrot.slane %v2229_v35, %v4623_v51 }
 0x4a1   : > { %v2241_v3 = vpop.permute.xlu0 %2240  ;;  %v2328_v47 = vsel %vm1847_vm1, %v2327_v5, %v2323_v58 }
 0x4a2   : > { %v2232_v50 = vpop.permute.xlu1 %2231  ;;  %v2345_v41 = vrot.slane %v2241_v3, %v4623_v51 }
 0x4a3   : > { %v2332_v19 = vrot.slane %v2232_v50, %v4628_v53 }
 0x4a5   : > { %v2247_v34 = vpop.permute.xlu0 %2246 }
 0x4a6   : > { %v2235_v13 = vpop.permute.xlu1 %2234 }
 0x4a7   : > { %v2336_v60 = vrot.slane %v2235_v13, %v4623_v51  ;;  %v2354_v13 = vrot.slane %v2247_v34, %v4623_v51 }
 0x4a9   : > { %v2253_v27 = vpop.permute.xlu0 %2252  ;;  %v2337_v9 = vsel %vm1847_vm1, %v2336_v60, %v2332_v19 }
 0x4aa   : > { %v2238_v36 = vpop.permute.xlu1 %2237  ;;  %v2363_v35 = vrot.slane %v2253_v27, %v4623_v51 }
 0x4ab   : > { %v2341_v54 = vrot.slane %v2238_v36, %v4628_v53 }
 0x4ad   : > { %v2259_v55 = vpop.permute.xlu0 %2258  ;;  %v2346_v23 = vsel %vm1847_vm1, %v2345_v41, %v2341_v54 }
 0x4ae   : > { %v2244_v18 = vpop.permute.xlu1 %2243 }
 0x4af   : > { %v2350_v0 = vrot.slane %v2244_v18, %v4628_v53  ;;  %v2372_v18 = vrot.slane %v2259_v55, %v4623_v51 }
 0x4b1   : > { %v2265_v26 = vpop.permute.xlu0 %2264  ;;  %v2355_v50 = vsel %vm1847_vm1, %v2354_v13, %v2350_v0 }
 0x4b2   : > { %v2250_v37 = vpop.permute.xlu1 %2249  ;;  %v2381_v34 = vrot.slane %v2265_v26, %v4623_v51 }
 0x4b3   : > { %v2359_v6 = vrot.slane %v2250_v37, %v4628_v53  ;;  %v2464_v37 = vsel %vm1984_vm2, %v2337_v9, %v2328_v47 }
 0x4b4   : > { %v2465_v41 = vsel %vm1986_vm3, %v2346_v23, %v2464_v37 }
 0x4b5   : > { %v2364_v60 = vsel %vm1847_vm1, %v2363_v35, %v2359_v6  ;;  %v2466_v54 = vsel %vm1988_vm4, %v2355_v50, %v2465_v41 }
 0x4b6   : > { %v2256_v44 = vpop.permute.xlu1 %2255  ;;  %v2467_v55 = vsel %vm1990_vm5, %v2364_v60, %v2466_v54 }
 0x4b7   : > { %v2368_v36 = vrot.slane %v2256_v44, %v4628_v53  ;;  %v2271_v44 = vpop.permute.xlu0 %2270 }
 0x4b9   : > { %v2373_v27 = vsel %vm1847_vm1, %v2372_v18, %v2368_v36 }
 0x4ba   : > { %v2262_v4 = vpop.permute.xlu1 %2261  ;;  %v2468_v6 = vsel %vm1992_vm6, %v2373_v27, %v2467_v55 }
 0x4bb   : > { %v2377_v3 = vrot.slane %v2262_v4, %v4628_v53  ;;  %v2390_v4 = vrot.slane %v2271_v44, %v4623_v51  ;;  %v2289_v36 = vpop.permute.xlu0 %2288 }
 0x4bd   : > { %v2382_v5 = vsel %vm1847_vm1, %v2381_v34, %v2377_v3 }
 0x4be   : > { %v2268_v58 = vpop.permute.xlu1 %2267  ;;  %v2469_v19 = vsel %vm1994_vm7, %v2382_v5, %v2468_v6 }
 0x4bf   : > { %v2386_v9 = vrot.slane %v2268_v58, %v4628_v53  ;;  %v2295_v50 = vpop.permute.xlu0 %2294 }
 0x4c1   : > { %v2391_v26 = vsel %vm1847_vm1, %v2390_v4, %v2386_v9  ;;  %v2417_v9 = vrot.slane %v2289_v36, %v4623_v51 }
 0x4c2   : > { %v2274_v23 = vpop.permute.xlu1 %2273  ;;  %v2470_v0 = vsel %vm1996_vm8, %v2391_v26, %v2469_v19  ;;  %v2426_v26 = vrot.slane %v2295_v50, %v4623_v51 }
 0x4c3   : > { %v2480_v13 = vsel %vm2007_vm9, %v2470_v0, 0.0  ;;  %v2301_v3 = vpop.permute.xlu0 %2300  ;;  %v2395_v19 = vrot.slane %v2274_v23, %v4628_v53 }
 0x4c4   : > { %2481 = vadd.xlane.f32.xlu1 %v2480_v13 }
 0x4c6   : > { %v2277_v35 = vpop.permute.xlu1 %2276 }
 0x4c7   : > { %v2307_v34 = vpop.permute.xlu0 %2306  ;;  %v2399_v58 = vrot.slane %v2277_v35, %v4623_v51 }
 0x4ca   : > { %v2280_v47 = vpop.permute.xlu1 %2279 }
 0x4cb   : > { %v2313_v27 = vpop.permute.xlu0 %2312  ;;  %v2404_v55 = vrot.slane %v2280_v47, %v4628_v53  ;;  %v2400_v47 = vsel %vm1847_vm1, %v2399_v58, %v2395_v19 }
 0x4cc   : > { %v2453_v50 = vrot.slane %v2313_v27, %v4623_v51 }
 0x4ce   : > { %v2283_v18 = vpop.permute.xlu1 %2282 }
 0x4cf   : > { %v2408_v41 = vrot.slane %v2283_v18, %v4623_v51  ;;  %v2435_v18 = vrot.slane %v2301_v3, %v4623_v51 }
 0x4d1   : > { %v2409_v0 = vsel %vm1847_vm1, %v2408_v41, %v2404_v55  ;;  %v2319_v41 = vpop.permute.xlu0 %2318 }
 0x4d2   : > { %v2286_v37 = vpop.permute.xlu1 %2285  ;;  %v2471_v23 = vsel %vm1984_vm2, %v2409_v0, %v2400_v47 }
 0x4d3   : > { %v2413_v54 = vrot.slane %v2286_v37, %v4628_v53 }
 0x4d5   : > { %v2418_v35 = vsel %vm1847_vm1, %v2417_v9, %v2413_v54 }
 0x4d6   : > { %v2292_v60 = vpop.permute.xlu1 %2291  ;;  %v2472_v3 = vsel %vm1986_vm3, %v2418_v35, %v2471_v23 }
 0x4d7   : > { %v2422_v4 = vrot.slane %v2292_v60, %v4628_v53  ;;  %v2444_v60 = vrot.slane %v2307_v34, %v4623_v51 }
 0x4d9   : > { %v2427_v36 = vsel %vm1847_vm1, %v2426_v26, %v2422_v4  ;;  %v2462_v4 = vrot.slane %v2319_v41, %v4623_v51 }
 0x4da   : > { %v2298_v44 = vpop.permute.xlu1 %2297  ;;  %v2473_v55 = vsel %vm1988_vm4, %v2427_v36, %v2472_v3 }
 0x4db   : > { %v2431_v6 = vrot.slane %v2298_v44, %v4628_v53 }
 0x4de   : > { %v2304_v5 = vpop.permute.xlu1 %2303 }
 0x4df   : > { %v2440_v13 = vrot.slane %v2304_v5, %v4628_v53  ;;  %v2436_v5 = vsel %vm1847_vm1, %v2435_v18, %v2431_v6 }
 0x4e0   : > { %v2474_v9 = vsel %vm1990_vm5, %v2436_v5, %v2473_v55 }
 0x4e1   : > { %v2445_v54 = vsel %vm1847_vm1, %v2444_v60, %v2440_v13 }
 0x4e2   : > { %v2310_v37 = vpop.permute.xlu1 %2309  ;;  %v2475_v26 = vsel %vm1992_vm6, %v2445_v54, %v2474_v9 }
 0x4e3   : > { %v2449_v44 = vrot.slane %v2310_v37, %v4628_v53 }
 0x4e5   : > { %v2454_v58 = vsel %vm1847_vm1, %v2453_v50, %v2449_v44 }
 0x4e6   : > { %v2316_v34 = vpop.permute.xlu1 %2315  ;;  %v2476_v6 = vsel %vm1994_vm7, %v2454_v58, %v2475_v26 }
 0x4e7   : > { %v2458_v27 = vrot.slane %v2316_v34, %v4628_v53 }
 0x4e9   : > { %v2463_v19 = vsel %vm1847_vm1, %v2462_v4, %v2458_v27 }
 0x4ea   : > { %v2477_v0 = vsel %vm1996_vm8, %v2463_v19, %v2476_v6 }
 0x4eb   : > { %v2483_v13 = vsel %vm2007_vm9, %v2477_v0, 0.0 }
 0x4ec   : > { %2484 = vadd.xlane.f32.xlu0 %v2483_v13 }
 0x551   : > { %v2482_v18 = vpop.xlane.xlu1 %2481 }
 0x552   : > { %v2495_v35 = vrot.slane %v2482_v18, %v4382_v17  ;;  %v2491_v51 = vrot.slane %v2482_v18, %v4376_v15  ;;  %v2499_v53 = vrot.slane %v2482_v18, %v4390_v42  ;;  %v2503_v37 = vrot.slane %v2482_v18, %v4387_v39 }
 0x553   : > { %v2507_v47 = vrot.slane %v2482_v18, %v4753_v56  ;;  %v2511_v50 = vrot.slane %v2482_v18, %v4758_v63  ;;  %v2515_v5 = vrot.slane %v2482_v18, %v4764_v8  ;;  %v2519_v58 = vrot.slane %v2482_v18, %v4770_v16 }
 0x554   : > { %3917 = vrcp.f32 %v2495_v35 }
 0x555   : > { %3919 = vrcp.f32 %v2491_v51 }
 0x556   : > { %3921 = vrcp.f32 %v2499_v53 }
 0x557   : > { %3923 = vrcp.f32 %v2503_v37 }
 0x558   : > { %3925 = vrcp.f32 %v2507_v47 }
 0x559   : > { %3927 = vrcp.f32 %v2511_v50  ;;  %v3802_v50 = vld [vmem:[%s5325_s7 + $0x10] sm:$0xff]  }
 0x55a   : > { %3929 = vrcp.f32 %v2515_v5  ;;  %v3805_v5 = vld [vmem:[%s5325_s7 + $0x60] sm:$0xff]  }
 0x55b   : > { %3931 = vrcp.f32 %v2519_v58  ;;  %v3810_v58 = vld [vmem:[%s5325_s7 + $0x30] sm:$0xff]  }
 0x55e   : > { %v3918_v60 = vpop.eup %3917 }
 0x55f   : > { %v3920_v36 = vpop.eup %3919  ;;  %v2573_v44 = vmul.f32 %v3918_v60, %v4798_v61  ;;  %v2572_v54 = vmul.f32 %v3918_v60, %v4784_v48  ;;  %v5359_v60 = vld [vmem:[#allocation22_spill] sm:$0xff] }
 0x560   : > { %v2570_v23 = vmul.f32 %v3920_v36, %v4777_v21  ;;  %v2569_v41 = vmul.f32 %v3920_v36, %v4775_v20  ;;  %v3922_v3 = vpop.eup %3921 }
 0x561   : > { %2633 = vperm.xlu1 %3603, %v2573_v44   ;;  %v3924_v55 = vpop.eup %3923  ;;  %v2576_v61 = vmul.f32 %v3922_v3, %v4788_v2  ;;  %v2575_v20 = vmul.f32 %v3922_v3, %v4811_v7  ;;  %v3801_v44 = vld [vmem:[%s5325_s7 + $0x50] sm:$0xff]   ;;  %v3806_v3 = vld [vmem:[%s5325_s7 + $0x20] sm:$0xff]  }
 0x562   : > { %2623 = vperm.xlu0 %3602, %v2570_v23   ;;  %v2579_v21 = vmul.f32 %v3924_v55, %v4800_v1  ;;  %v3926_v34 = vpop.eup %3925  ;;  %v2578_v48 = vmul.f32 %v3924_v55, %v4826_v40  ;;  %v3803_v23 = vld [vmem:[%s5325_s7 + $0x58] sm:$0xff]   ;;  %v3808_v55 = vld [vmem:[%s5325_s7 + $0x28] sm:$0xff]  }
 0x563   : > { %v2582_v4 = vmul.f32 %v3926_v34, %v4813_v31  ;;  %v3928_v9 = vpop.eup %3927  ;;  %v2581_v1 = vmul.f32 %v3926_v34, %v4839_v33  ;;  %v3812_v34 = vld [vmem:[%s5325_s7 + $0x38] sm:$0xff]  }
 0x564   : > { %v2585_v2 = vmul.f32 %v3928_v9, %v4828_v62  ;;  %v3930_v27 = vpop.eup %3929  ;;  %v2584_v7 = vmul.f32 %v3928_v9, %v4854_v32 }
 0x565   : > { %2618 = vperm.xlu1 %3603, %v2569_v41   ;;  %v2588_v26 = vmul.f32 %v3930_v27, %v4841_v14  ;;  %v5016_v19 = vpop.eup %3931  ;;  %v2587_v33 = vmul.f32 %v3930_v27, %v4865_v11  ;;  %v3804_v41 = vld [vmem:[%s5325_s7 + $0x18] sm:$0xff]  }
 0x566   : > { %2628 = vperm.xlu0 %3602, %v2572_v54   ;;  %v2591_v31 = vmul.f32 %v5016_v19, %v4856_v43  ;;  %v3807_v54 = vld [vmem:[%s5325_s7 + $0x68] sm:$0xff]  }
 0x569   : > { %2643 = vperm.xlu1 %3603, %v2576_v61   ;;  %v3809_v61 = vld [vmem:[%s5325_s7 + $0x70] sm:$0xff]  }
 0x56a   : > { %2653 = vperm.xlu0 %3602, %v2579_v21   ;;  %v3811_v21 = vld [vmem:[%s5325_s7 + $0x78] sm:$0xff]  }
 0x56d   : > { %2638 = vperm.xlu1 %3603, %v2575_v20  }
 0x56e   : > { %2663 = vperm.xlu0 %3602, %v2582_v4  }
 0x571   : > { %2648 = vperm.xlu1 %3603, %v2578_v48  }
 0x572   : > { %2673 = vperm.xlu0 %3602, %v2585_v2  }
 0x575   : > { %2658 = vperm.xlu1 %3603, %v2581_v1  }
 0x576   : > { %2683 = vperm.xlu0 %3602, %v2588_v26  }
 0x579   : > { %2668 = vperm.xlu1 %3603, %v2584_v7   ;;  %v2485_v40 = vpop.xlane.xlu0 %2484 }
 0x57a   : > { %2693 = vperm.xlu0 %3602, %v2591_v31   ;;  %v2527_v62 = vrot.slane %v2485_v40, %v4382_v17  ;;  %v2523_v6 = vrot.slane %v2485_v40, %v4376_v15  ;;  %v2531_v14 = vrot.slane %v2485_v40, %v4390_v42  ;;  %v2535_v32 = vrot.slane %v2485_v40, %v4387_v39 }
 0x57b   : > { %v2539_v43 = vrot.slane %v2485_v40, %v4753_v56  ;;  %v2543_v15 = vrot.slane %v2485_v40, %v4758_v63  ;;  %v2547_v39 = vrot.slane %v2485_v40, %v4764_v8  ;;  %v2551_v63 = vrot.slane %v2485_v40, %v4770_v16  ;;  %v3954_v40 = vld [vmem:[%s5320_s2] sm:$0xff] }
 0x57c   : > { %3933 = vrcp.f32 %v2527_v62 }
 0x57d   : > { %2678 = vperm.xlu1 %3603, %v2587_v33   ;;  %3935 = vrcp.f32 %v2523_v6  ;;  %v3955_v6 = vld [vmem:[%s5320_s2 + $0x18] sm:$0x3] }
 0x57e   : > { %3937 = vrcp.f32 %v2531_v14 }
 0x57f   : > { %3939 = vrcp.f32 %v2535_v32 }
 0x580   : > { %3941 = vrcp.f32 %v2539_v43 }
 0x581   : > { %3943 = vrcp.f32 %v2543_v15 }
 0x582   : > { %3945 = vrcp.f32 %v2547_v39 }
 0x583   : > { %3947 = vrcp.f32 %v2551_v63  ;;  %v3958_v63 = vld [vmem:[%s5320_s2 + $0x20] sm:$0xff] }
 0x586   : > { %v3934_v0 = vpop.eup %3933 }
 0x587   : > { %v3936_v13 = vpop.eup %3935  ;;  %v2597_v18 = vmul.f32 %v3934_v0, %v4905_v49  ;;  %v2596_v35 = vmul.f32 %v3934_v0, %v4897_v38  ;;  %v3956_v0 = vld [vmem:[%s5320_s2 + $0x10] sm:$0xff] }
 0x588   : > { %v2594_v17 = vmul.f32 %v3936_v13, %v4889_v30  ;;  %v2593_v11 = vmul.f32 %v3936_v13, %v4881_v10  ;;  %v3938_v42 = vpop.eup %3937 }
 0x589   : > { %2713 = vperm.xlu0 %3602, %v2597_v18   ;;  %v2600_v56 = vmul.f32 %v3938_v42, %v4867_v25  ;;  %v3940_v49 = vpop.eup %3939  ;;  %v2599_v30 = vmul.f32 %v3938_v42, %v4913_v29 }
 0x58a   : > { %2703 = vperm.xlu1 %3603, %v2594_v17   ;;  %v2603_v10 = vmul.f32 %v3940_v49, %v4875_v46  ;;  %v3942_v51 = vpop.eup %3941  ;;  %v2602_v38 = vmul.f32 %v3940_v49, %v4917_v52  ;;  %v3957_v49 = vld [vmem:[%s5320_s2 + $0x28] sm:$0x3] }
 0x58b   : > { %v2606_v8 = vmul.f32 %v3942_v51, %v4883_v59  ;;  %v3944_v53 = vpop.eup %3943  ;;  %v2605_v25 = vmul.f32 %v3942_v51, %v4920_v24  ;;  %v2590_v24 = vmul.f32 %v5016_v19, %v5359_v60  ;;  %v3953_v19 = vld [vmem:[%s5320_s2 + $0x8] sm:$0x3] }
 0x58c   : > { %v2609_v29 = vmul.f32 %v3944_v53, %v4891_v28  ;;  %v3946_v37 = vpop.eup %3945  ;;  %v2608_v16 = vmul.f32 %v3944_v53, %v4923_v12  ;;  %v5360_v28 = vld [vmem:[#allocation23_spill] sm:$0xff]  ;;  %v3797_v12 = vld [vmem:[%s5325_s7 + $0x40] sm:$0xff]  }
 0x58d   : > { %2698 = vperm.xlu0 %3602, %v2593_v11   ;;  %v2612_v46 = vmul.f32 %v3946_v37, %v4899_v22  ;;  %v3948_v52 = vpop.eup %3947  ;;  %v2611_v47 = vmul.f32 %v3946_v37, %v4926_v45  ;;  %v3798_v22 = vld [vmem:[%s5325_s7] sm:$0xff]   ;;  %3505 = vmatprep.subr.bf16.mxu0 %v3797_v12  ;;  %v3800_v45 = vld [vmem:[%s5325_s7 + $0x8] sm:$0xff]  }
 0x58e   : > { %2708 = vperm.xlu1 %3603, %v2596_v35   ;;  %v2615_v59 = vmul.f32 %v3948_v52, %v4907_v57  ;;  %v2614_v36 = vmul.f32 %v3948_v52, %v5360_v28  ;;  %v3799_v57 = vld [vmem:[%s5325_s7 + $0x48] sm:$0xff]   ;;  %3506 = vmatpush3.bf16.msra.mxu0 %v3798_v22 }
 0x58f   : > { %3507 = vmatprep.subr.bf16.mxu0 %v3799_v57  ;;  %v3961_v57 = vld [vmem:[%s5320_s2 + $0x30] sm:$0xff] }
 0x591   : > { %2723 = vperm.xlu0 %3602, %v2600_v56  }
 0x592   : > { %2718 = vperm.xlu1 %3603, %v2599_v30   ;;  %3508 = vmatpush3.bf16.msra.mxu0 %v3800_v45 }
 0x593   : > { %3509 = vmatprep.subr.bf16.mxu0 %v3801_v44  ;;  %v3962_v44 = vld [vmem:[%s5320_s2 + $0x58] sm:$0x3] }
 0x595   : > { %2733 = vperm.xlu0 %3602, %v2603_v10  }
 0x596   : > { %2728 = vperm.xlu1 %3603, %v2602_v38   ;;  %3510 = vmatpush3.bf16.msra.mxu0 %v3802_v50 }
 0x597   : > { %3511 = vmatprep.subr.bf16.mxu0 %v3803_v23  ;;  %v3963_v23 = vld [vmem:[%s5320_s2 + $0x88] sm:$0x3] }
 0x599   : > { %2743 = vperm.xlu0 %3602, %v2606_v8  }
 0x59a   : > { %2738 = vperm.xlu1 %3603, %v2605_v25   ;;  %3512 = vmatpush3.bf16.msra.mxu0 %v3804_v41 }
 0x59b   : > { %3513 = vmatprep.subr.bf16.mxu0 %v3805_v5 }
 0x59d   : > { %2753 = vperm.xlu0 %3602, %v2609_v29  }
 0x59e   : > { %2748 = vperm.xlu1 %3603, %v2608_v16   ;;  %3514 = vmatpush3.bf16.msra.mxu0 %v3806_v3  ;;  %v3964_v3 = vld [vmem:[%s5320_s2 + $0x40] sm:$0xff] }
 0x59f   : > { %3515 = vmatprep.subr.bf16.mxu0 %v3807_v54 }
 0x5a1   : > { %2763 = vperm.xlu0 %3602, %v2612_v46  }
 0x5a2   : > { %2758 = vperm.xlu1 %3603, %v2611_v47   ;;  %3516 = vmatpush3.bf16.msra.mxu0 %v3808_v55  ;;  %v3959_v47 = vld [vmem:[%s5320_s2 + $0x38] sm:$0x3] }
 0x5a3   : > { %3517 = vmatprep.subr.bf16.mxu0 %v3809_v61  ;;  %v3965_v55 = vld [vmem:[%s5320_s2 + $0x98] sm:$0x3] }
 0x5a5   : > { %2773 = vperm.xlu0 %3602, %v2615_v59  }
 0x5a6   : > { %2688 = vperm.xlu1 %3603, %v2590_v24   ;;  %3518 = vmatpush3.bf16.msra.mxu0 %v3810_v58  ;;  %v3966_v58 = vld [vmem:[%s5320_s2 + $0x80] sm:$0xff] }
 0x5a7   : > { %3519 = vmatprep.subr.bf16.mxu0 %v3811_v21 }
 0x5a9   : > { %2768 = vperm.xlu0 %3602, %v2614_v36   ;;  %v3960_v36 = vld [vmem:[%s5320_s2 + $0x48] sm:$0x3] }
 0x5aa   : > { %3520 = vmatpush3.bf16.msra.mxu0 %v3812_v34 }
 0x5e0   : > { %v2634_v20 = vpop.permute.xlu1 %2633 }
 0x5e1   : > { %v2624_v4 = vpop.permute.xlu0 %2623  ;;  %v2779_v33 = vmul.f32 %v3955_v6, %v2634_v20  ;;  %v3969_v6 = vld [vmem:[%s5320_s2 + $0xa8] sm:$0x3] }
 0x5e2   : > { %v2777_v7 = vmul.f32 %v3953_v19, %v2624_v4  ;;  %v3967_v4 = vld [vmem:[%s5320_s2 + $0x90] sm:$0xff] }
 0x5e3   : > { %v2816_v17 = vsel %vm1725_vm0, %v2779_v33, 0.0 }
 0x5e4   : > { %v2619_v9 = vpop.permute.xlu1 %2618  ;;  %v2808_v14 = vsel %vm1725_vm0, %v2777_v7, 0.0 }
 0x5e5   : > { %v2629_v48 = vpop.permute.xlu0 %2628  ;;  %v2776_v62 = vmul.f32 %v3954_v40, %v2619_v9 }
 0x5e6   : > { %v2778_v43 = vmul.f32 %v3956_v0, %v2629_v48 }
 0x5e7   : > { %v2809_v32 = vadd.f32 %v2808_v14, %v2776_v62 }
 0x5e8   : > { %v2644_v2 = vpop.permute.xlu1 %2643  ;;  %v2817_v11 = vadd.f32 %v2816_v17, %v2778_v43  ;;  %v3970_v43 = vld [vmem:[%s5320_s2 + $0xa0] sm:$0xff]  ;;  %v3971_v17 = vld [vmem:[%s5320_s2 + $0x68] sm:$0x3] }
 0x5e9   : > { %v2654_v27 = vpop.permute.xlu0 %2653  ;;  %v2810_v15 = vrot.slane %v2809_v32, 4  ;;  %v2781_v30 = vmul.f32 %v3957_v49, %v2644_v2 }
 0x5ea   : > { %v2818_v56 = vrot.slane %v2817_v11, 4  ;;  %v2783_v59 = vmul.f32 %v3959_v47, %v2654_v27 }
 0x5eb   : > { %v2811_v39 = vadd.f32 %v2810_v15, %v2809_v32  ;;  %v2824_v25 = vsel %vm1725_vm0, %v2781_v30, 0.0 }
 0x5ec   : > { %v2639_v1 = vpop.permute.xlu1 %2638  ;;  %v2819_v38 = vadd.f32 %v2818_v56, %v2817_v11  ;;  %v2832_v34 = vsel %vm1725_vm0, %v2783_v59, 0.0  ;;  %v3972_v56 = vld [vmem:[%s5320_s2 + $0x60] sm:$0xff] }
 0x5ed   : > { %v2664_v26 = vpop.permute.xlu0 %2663  ;;  %v2780_v10 = vmul.f32 %v3958_v63, %v2639_v1  ;;  %v2812_v51 = vrot.slane %v2811_v39, 2  ;;  %v3968_v1 = vld [vmem:[%s5320_s2 + $0x50] sm:$0xff] }
 0x5ee   : > { %v2820_v16 = vrot.slane %v2819_v38, 2  ;;  %v2785_v12 = vmul.f32 %v3960_v36, %v2664_v26 }
 0x5ef   : > { %v2825_v29 = vadd.f32 %v2824_v25, %v2780_v10  ;;  %v2813_v37 = vadd.f32 %v2812_v51, %v2811_v39  ;;  %v3973_v25 = vld [vmem:[%s5320_s2 + $0xb8] sm:$0x3] }
 0x5f0   : > { %v2649_v31 = vpop.permute.xlu1 %2648  ;;  %v2821_v28 = vadd.f32 %v2820_v16, %v2819_v38  ;;  %v2840_v27 = vsel %vm1725_vm0, %v2785_v12, 0.0 }
 0x5f1   : > { %v2674_v13 = vpop.permute.xlu0 %2673  ;;  %v2826_v60 = vrot.slane %v2825_v29, 4  ;;  %v2814_v24 = vrot.slane %v2813_v37, 1  ;;  %v2782_v45 = vmul.f32 %v3961_v57, %v2649_v31 }
 0x5f2   : > { %v2787_v50 = vmul.f32 %v3962_v44, %v2674_v13  ;;  %v2822_v2 = vrot.slane %v2821_v28, 1 }
 0x5f3   : > { %v2827_v20 = vadd.f32 %v2826_v60, %v2825_v29  ;;  %v2815_v48 = vadd.f32 %v2814_v24, %v2813_v37  ;;  %v2833_v7 = vadd.f32 %v2832_v34, %v2782_v45 }
 0x5f4   : > { %v2659_v18 = vpop.permute.xlu1 %2658  ;;  %v2848_v31 = vsel %vm1725_vm0, %v2787_v50, 0.0  ;;  %v2823_v10 = vadd.f32 %v2822_v2, %v2821_v28  ;;  %v3975_v50 = vld [vmem:[%s5320_s2 + $0xc8] sm:$0x3] }
 0x5f5   : > { %v2684_v42 = vpop.permute.xlu0 %2683  ;;  %v2784_v54 = vmul.f32 %v3964_v3, %v2659_v18  ;;  %v2828_v18 = vrot.slane %v2827_v20, 2  ;;  %v2834_v51 = vrot.slane %v2833_v7, 4 }
 0x5f6   : > { %v2789_v15 = vmul.f32 %v3971_v17, %v2684_v42  ;;  %v2937_v42 = vpack.c.bf16 %v2815_v48, %v2815_v48  ;;  %v2938_v57 = vpack.c.bf16 %v2823_v10, %v2823_v10 }
 0x5f7   : > { %v2841_v14 = vadd.f32 %v2840_v27, %v2784_v54  ;;  %v2829_v47 = vadd.f32 %v2828_v18, %v2827_v20  ;;  %v2835_v45 = vadd.f32 %v2834_v51, %v2833_v7  ;;  %v3976_v54 = vld [vmem:[%s5320_s2 + $0xc0] sm:$0xff]  ;;  %v3977_v7 = vld [vmem:[%s5320_s2 + $0xd8] sm:$0x3] }
 0x5f8   : > { %v2669_v35 = vpop.permute.xlu1 %2668  ;;  %v5184_v27 = vunpack.c.l.b16 %v2938_v57 }
 0x5f9   : > { %v5116_v8 = vpop.permute.xlu0 %2693  ;;  %v2786_v26 = vmul.f32 %v3968_v1, %v2669_v35  ;;  %v2842_v37 = vrot.slane %v2841_v14, 4  ;;  %v2836_v1 = vrot.slane %v2835_v45, 2 }
 0x5fb   : > { %v2849_v39 = vadd.f32 %v2848_v31, %v2786_v26 }
 0x5fc   : > { %v2679_v53 = vpop.permute.xlu1 %2678 }
 0x5fd   : > { %v2788_v49 = vmul.f32 %v3972_v56, %v2679_v53  ;;  %v2856_v53 = vsel %vm1725_vm0, %v2789_v15, 0.0  ;;  %v2850_v24 = vrot.slane %v2849_v39, 4  ;;  %v2837_v56 = vadd.f32 %v2836_v1, %v2835_v45 }
 0x5ff   : > { %v2857_v28 = vadd.f32 %v2856_v53, %v2788_v49  ;;  %v2851_v20 = vadd.f32 %v2850_v24, %v2849_v39 }
 0x601   : > { %v2852_v17 = vrot.slane %v2851_v20, 2 }
 0x603   : > { %v2853_v53 = vadd.f32 %v2852_v17, %v2851_v20 }
 0x608   : > { %v2714_v46 = vpop.permute.xlu0 %2713 }
 0x609   : > { %v2704_v52 = vpop.permute.xlu1 %2703  ;;  %v2795_v61 = vmul.f32 %v3965_v55, %v2714_v46  ;;  %v3974_v46 = vld [vmem:[%s5320_s2 + $0xb0] sm:$0xff] }
 0x60a   : > { %v2793_v41 = vmul.f32 %v3963_v23, %v2704_v52 }
 0x60b   : > { %v2880_v32 = vsel %vm1725_vm0, %v2795_v61, 0.0  ;;  %v5181_v61 = vunpack.c.l.b16 %v2937_v42 }
 0x60c   : > { %v2699_v22 = vpop.permute.xlu0 %2698  ;;  %v2872_v40 = vsel %vm1725_vm0, %v2793_v41, 0.0  ;;  %v2843_v41 = vadd.f32 %v2842_v37, %v2841_v14 }
 0x60d   : > { %v2709_v5 = vpop.permute.xlu1 %2708  ;;  %v2792_v21 = vmul.f32 %v3966_v58, %v2699_v22  ;;  %v2830_v58 = vrot.slane %v2829_v47, 1 }
 0x60e   : > { %v2794_v9 = vmul.f32 %v3967_v4, %v2709_v5  ;;  %v2858_v4 = vrot.slane %v2857_v28, 4 }
 0x60f   : > { %v2873_v0 = vadd.f32 %v2872_v40, %v2792_v21  ;;  %v2844_v40 = vrot.slane %v2843_v41, 2 }
 0x610   : > { %v2724_v19 = vpop.permute.xlu0 %2723  ;;  %v2881_v11 = vadd.f32 %v2880_v32, %v2794_v9  ;;  %v5193_v32 = vadd.f32 %v2830_v58, %v2829_v47  ;;  %v2859_v15 = vadd.f32 %v2858_v4, %v2857_v28  ;;  %v2838_v28 = vrot.slane %v2837_v56, 1 }
 0x611   : > { %v2719_v62 = vpop.permute.xlu1 %2718  ;;  %v2797_v33 = vmul.f32 %v3969_v6, %v2724_v19  ;;  %v2874_v16 = vrot.slane %v2873_v0, 4  ;;  %v2845_v51 = vadd.f32 %v2844_v40, %v2843_v41  ;;  %v3983_v41 = vld [vmem:[%s5320_s2 + $0xf8] sm:$0x3] }
 0x612   : > { %v2796_v13 = vmul.f32 %v3970_v43, %v2719_v62  ;;  %v2882_v59 = vrot.slane %v2881_v11, 4  ;;  %v3978_v62 = vld [vmem:[%s5320_s2 + $0x78] sm:$0x3]  ;;  %v3979_v43 = vld [vmem:[%s5320_s2 + $0xd0] sm:$0xff]  ;;  %v2939_v47 = vpack.c.bf16 %v5193_v32, %v5193_v32 }
 0x613   : > { %v2888_v35 = vsel %vm1725_vm0, %v2797_v33, 0.0  ;;  %v2875_v5 = vadd.f32 %v2874_v16, %v2873_v0  ;;  %v2791_v6 = vmul.f32 %v3978_v62, %v5116_v8  ;;  %v3981_v16 = vld [vmem:[%s5320_s2 + $0xe0] sm:$0xff] }
 0x614   : > { %v2889_v30 = vadd.f32 %v2888_v35, %v2796_v13  ;;  %v2734_v63 = vpop.permute.xlu0 %2733  ;;  %v2883_v21 = vadd.f32 %v2882_v59, %v2881_v11  ;;  %v2860_v59 = vrot.slane %v2859_v15, 2 }
 0x615   : > { %v2729_v38 = vpop.permute.xlu1 %2728  ;;  %v2799_v29 = vmul.f32 %v3973_v25, %v2734_v63  ;;  %v2876_v33 = vrot.slane %v2875_v5, 2  ;;  %v3980_v63 = vld [vmem:[%s5320_s2 + $0xe8] sm:$0x3] }
 0x616   : > { %v2798_v52 = vmul.f32 %v3974_v46, %v2729_v38  ;;  %v2890_v36 = vrot.slane %v2889_v30, 4  ;;  %v2884_v0 = vrot.slane %v2883_v21, 2  ;;  %v2864_v38 = vsel %vm1725_vm0, %v2791_v6, 0.0 }
 0x617   : > { %v2896_v60 = vsel %vm1725_vm0, %v2799_v29, 0.0  ;;  %v2877_v25 = vadd.f32 %v2876_v33, %v2875_v5 }
 0x618   : > { %v2897_v12 = vadd.f32 %v2896_v60, %v2798_v52  ;;  %v2744_v22 = vpop.permute.xlu0 %2743  ;;  %v2891_v9 = vadd.f32 %v2890_v36, %v2889_v30  ;;  %v2885_v42 = vadd.f32 %v2884_v0, %v2883_v21  ;;  %v2854_v21 = vrot.slane %v2853_v53, 1 }
 0x619   : > { %v2739_v44 = vpop.permute.xlu1 %2738  ;;  %v2801_v23 = vmul.f32 %v3975_v50, %v2744_v22  ;;  %v2878_v45 = vrot.slane %v2877_v25, 1  ;;  %v3982_v50 = vld [vmem:[%s5320_s2 + $0x70] sm:$0xff]  ;;  %v2839_v0 = vadd.f32 %v2838_v28, %v2837_v56 }
 0x61a   : > { %v2898_v3 = vrot.slane %v2897_v12, 4  ;;  %v2800_v55 = vmul.f32 %v3976_v54, %v2739_v44  ;;  %v2892_v11 = vrot.slane %v2891_v9, 2  ;;  %v2886_v54 = vrot.slane %v2885_v42, 1 }
 0x61b   : > { %v2904_v34 = vsel %vm1725_vm0, %v2801_v23, 0.0  ;;  %v2940_v56 = vpack.c.bf16 %v2839_v0, %v2839_v0 }
 0x61c   : > { %v2905_v48 = vadd.f32 %v2904_v34, %v2800_v55  ;;  %v2754_v2 = vpop.permute.xlu0 %2753  ;;  %v2899_v26 = vadd.f32 %v2898_v3, %v2897_v12  ;;  %v2893_v60 = vadd.f32 %v2892_v11, %v2891_v9  ;;  %v2846_v3 = vrot.slane %v2845_v51, 1 }
 0x61d   : > { %v2749_v19 = vpop.permute.xlu1 %2748  ;;  %v2803_v31 = vmul.f32 %v3977_v7, %v2754_v2  ;;  %v2861_v34 = vadd.f32 %v2860_v59, %v2859_v15  ;;  %v2879_v7 = vadd.f32 %v2878_v45, %v2877_v25  ;;  %v2887_v6 = vadd.f32 %v2886_v54, %v2885_v42 }
 0x61e   : > { %v2906_v14 = vrot.slane %v2905_v48, 4  ;;  %v2802_v13 = vmul.f32 %v3979_v43, %v2749_v19  ;;  %v2900_v49 = vrot.slane %v2899_v26, 2  ;;  %v2894_v20 = vrot.slane %v2893_v60, 1 }
 0x61f   : > { %v2912_v18 = vsel %vm1725_vm0, %v2803_v31, 0.0  ;;  %v2862_v43 = vrot.slane %v2861_v34, 1  ;;  %v2847_v17 = vadd.f32 %v2846_v3, %v2845_v51 }
 0x620   : > { %v2907_v35 = vadd.f32 %v2906_v14, %v2905_v48  ;;  %v2764_v39 = vpop.permute.xlu0 %2763  ;;  %v2913_v8 = vadd.f32 %v2912_v18, %v2802_v13  ;;  %v2901_v36 = vadd.f32 %v2900_v49, %v2899_v26  ;;  %v3984_v26 = vld [vmem:[%s5320_s2 + $0xf0] sm:$0xff]  ;;  %v2895_v13 = vadd.f32 %v2894_v20, %v2893_v60 }
 0x621   : > { %v2759_v30 = vpop.permute.xlu1 %2758  ;;  %v2805_v10 = vmul.f32 %v3980_v63, %v2764_v39  ;;  %v2855_v39 = vadd.f32 %v2854_v21, %v2853_v53  ;;  %v2945_v49 = vpack.c.bf16 %v2879_v7, %v2879_v7  ;;  %v2946_v63 = vpack.c.bf16 %v2887_v6, %v2887_v6 }
 0x622   : > { %v2908_v29 = vrot.slane %v2907_v35, 2  ;;  %v2914_v37 = vrot.slane %v2913_v8, 4  ;;  %v2804_v46 = vmul.f32 %v3981_v16, %v2759_v30  ;;  %v2902_v48 = vrot.slane %v2901_v36, 1 }
 0x623   : > { %v2920_v52 = vsel %vm1725_vm0, %v2805_v10, 0.0  ;;  %v2863_v42 = vadd.f32 %v2862_v43, %v2861_v34  ;;  %v2941_v51 = vpack.c.bf16 %v2847_v17, %v2847_v17  ;;  %v2942_v60 = vpack.c.bf16 %v2855_v39, %v2855_v39  ;;  %v5361_v43 = vld [vmem:[#allocation21_spill] sm:$0xff] }
 0x624   : > { %v2774_v24 = vpop.permute.xlu0 %2773  ;;  %v2915_v12 = vadd.f32 %v2914_v37, %v2913_v8  ;;  %v2921_v22 = vadd.f32 %v2920_v52, %v2804_v46  ;;  %v2909_v44 = vadd.f32 %v2908_v29, %v2907_v35  ;;  %v2903_v15 = vadd.f32 %v2902_v48, %v2901_v36 }
 0x625   : > { %v2689_v57 = vpop.permute.xlu1 %2688  ;;  %v2807_v5 = vmul.f32 %v3983_v41, %v2774_v24  ;;  %v2971_v29 = vunpack.c.l.b16 %v2939_v47  ;;  %v2947_v37 = vpack.c.bf16 %v2895_v13, %v2895_v13  ;;  %v2978_v53 = vunpack.c.l.b16 %v2946_v63  ;;  %v5362_v13 = vld [vmem:[#allocation20_spill] sm:$0xff] }
 0x626   : > { %v2790_v23 = vmul.f32 %v3982_v50, %v2689_v57  ;;  %v2916_v55 = vrot.slane %v2915_v12, 2  ;;  %v2922_v58 = vrot.slane %v2921_v22, 4  ;;  %v2910_v31 = vrot.slane %v2909_v44, 1 }
 0x627   : > { %v2928_v62 = vsel %vm1725_vm0, %v2807_v5, 0.0  ;;  %v2948_v46 = vpack.c.bf16 %v2903_v15, %v2903_v15  ;;  %v2977_v36 = vunpack.c.l.b16 %v2945_v49  ;;  %v2943_v57 = vpack.c.bf16 %v2863_v42, %v2863_v42 }
 0x628   : > { %v2865_v4 = vadd.f32 %v2864_v38, %v2790_v23  ;;  %v2769_v9 = vpop.permute.xlu0 %2768  ;;  %v2917_v2 = vadd.f32 %v2916_v55, %v2915_v12  ;;  %v2923_v1 = vadd.f32 %v2922_v58, %v2921_v22  ;;  %v2911_v8 = vadd.f32 %v2910_v31, %v2909_v44 }
 0x629   : > { %v2806_v19 = vmul.f32 %v3984_v26, %v2769_v9  ;;  %v2979_v45 = vunpack.c.l.b16 %v2947_v37  ;;  %v2972_v47 = vunpack.c.l.b16 %v2940_v56  ;;  %v2980_v23 = vunpack.c.l.b16 %v2948_v46 }
 0x62a   : > { %v2866_v40 = vrot.slane %v2865_v4, 4  ;;  %v2918_v33 = vrot.slane %v2917_v2, 1  ;;  %v2924_v14 = vrot.slane %v2923_v1, 2  ;;  %v2949_v24 = vpack.c.bf16 %v2911_v8, %v2911_v8 }
 0x62b   : > { %v2929_v32 = vadd.f32 %v2928_v62, %v2806_v19  ;;  %v2985_v5 = vsel %vm1984_vm2, %v5184_v27, %v5181_v61  ;;  %v2973_v3 = vunpack.c.l.b16 %v2941_v51  ;;  %v2974_v58 = vunpack.c.l.b16 %v2942_v60 }
 0x62c   : > { %v2867_v18 = vadd.f32 %v2866_v40, %v2865_v4  ;;  %v2925_v11 = vadd.f32 %v2924_v14, %v2923_v1  ;;  %v2919_v10 = vadd.f32 %v2918_v33, %v2917_v2  ;;  %v2981_v54 = vunpack.c.l.b16 %v2949_v24 }
 0x62d   : > { %v2930_v35 = vrot.slane %v2929_v32, 4  ;;  %v2992_v21 = vsel %vm1984_vm2, %v2978_v53, %v2977_v36  ;;  %v2986_v4 = vsel %vm1986_vm3, %v2971_v29, %v2985_v5  ;;  %v2975_v9 = vunpack.c.l.b16 %v2943_v57 }
 0x62e   : > { %v2868_v30 = vrot.slane %v2867_v18, 2  ;;  %v2926_v38 = vrot.slane %v2925_v11, 1  ;;  %v2950_v12 = vpack.c.bf16 %v2919_v10, %v2919_v10  ;;  %v2993_v48 = vsel %vm1986_vm3, %v2979_v45, %v2992_v21 }
 0x62f   : > { %v2931_v25 = vadd.f32 %v2930_v35, %v2929_v32  ;;  %v2987_v19 = vsel %vm1988_vm4, %v2972_v47, %v2986_v4  ;;  %v2994_v61 = vsel %vm1988_vm4, %v2980_v23, %v2993_v48 }
 0x630   : > { %v2869_v16 = vadd.f32 %v2868_v30, %v2867_v18  ;;  %v2927_v52 = vadd.f32 %v2926_v38, %v2925_v11  ;;  %v2982_v34 = vunpack.c.l.b16 %v2950_v12  ;;  %v2988_v27 = vsel %vm1990_vm5, %v2973_v3, %v2987_v19 }
 0x631   : > { %v2932_v59 = vrot.slane %v2931_v25, 2  ;;  %v2995_v7 = vsel %vm1990_vm5, %v2981_v54, %v2994_v61  ;;  %v2989_v40 = vsel %vm1992_vm6, %v2974_v58, %v2988_v27  ;;  %v5363_v18 = vpack.c.bf16 %v5361_v43, %v5362_v13 }
 0x632   : > { %v2870_v28 = vrot.slane %v2869_v16, 1  ;;  %v2951_v44 = vpack.c.bf16 %v2927_v52, %v2927_v52  ;;  %v2996_v62 = vsel %vm1992_vm6, %v2982_v34, %v2995_v7  ;;  %v2990_v6 = vsel %vm1994_vm7, %v2975_v9, %v2989_v40 }
 0x633   : > { %v2933_v22 = vadd.f32 %v2932_v59, %v2931_v25 }
 0x634   : > { %v2871_v50 = vadd.f32 %v2870_v28, %v2869_v16  ;;  %v2983_v2 = vunpack.c.l.b16 %v2951_v44 }
 0x635   : > { %v2934_v41 = vrot.slane %v2933_v22, 1 }
 0x636   : > { %v2944_v55 = vpack.c.bf16 %v2871_v50, %v2871_v50  ;;  %v2997_v33 = vsel %vm1994_vm7, %v2983_v2, %v2996_v62 }
 0x637   : > { %v2935_v20 = vadd.f32 %v2934_v41, %v2933_v22 }
 0x638   : > { %v2976_v26 = vunpack.c.l.b16 %v2944_v55 }
 0x639   : > { %v2952_v1 = vpack.c.bf16 %v2935_v20, %v2935_v20 }
 0x63a   : > { %v2991_v14 = vsel %vm1996_vm8, %v2976_v26, %v2990_v6 }
 0x63b   : > { %v2984_v31 = vunpack.c.l.b16 %v2952_v1 }
 0x63d   : > { %v2998_v32 = vsel %vm1996_vm8, %v2984_v31, %v2997_v33 }
 0x63e   : > { %v2999_v0 = vpack.c.b16 %v2998_v32, %v2991_v14 }
 0x640   : > { %3168 = vmatprep.mubr.bf16.mxu0 %v2999_v0 }
 0x641   : > { %3169 = vmatmul.mubr.bf16.vlgmr.msra.gmra.mrb[8].mxu0 %v5363_v18 }
 0x642   : > { %4054 = shalt.err (!%p4051_p2)
}
 0x643   : > { %s4055_s11 = scalar_lea.hbm %s5328_s10, 512  ;;  %p5365_p1 = pmov %p5364_p0 }
 0x644   : > { %p4056_p5 = scmp.ne.s32.totalorder %s5328_s10, %s4055_s11  ;;  %p4061_p13 = scmp.lt.u32.totalorder %s4055_s11, %s5328_s10 }
 0x646   : > { %p4057_p6 = pnand %p4056_p5, %p5365_p1 }
 0x648   : > { %p4058_p9 = pneg %p4057_p6 }
 0x64a   : > { %p4063_p10 = pnand %p4061_p13, %p4058_p9 }
 0x64c   : > { %4066 = shalt.err (!%p4063_p10)
}
 0x64d   : > { %s4150_s26 = smov 128   ;;  %s4151_s29 = smov 8   ;;  %v3471_v15 = vld [vmem:[%s5326_s8] ss:$0 sm:$0xff] }
 0x64e   : > { %p5366_p11 = pmov %p5364_p0  ;;  %s3499_s11 = sshll.u32 %s4231_s17, 7 }
 0x64f   : > { %s5265_s20 = scalar_lea.hbm %s5327_s9, %s3499_s11  ;;  %s5273_s21 = scalar_lea.sflag [#allocation6], %s378_s24 }
 0x650   : > { %3537 = dma.vmem_to_hbm [thread:$0]  (%p5366_p11), %s3226_s15, 512, %s5328_s10, [#allocation11], %s4150_s26, %s4150_s26, %s4151_s29  }
 0x651   : > { %s3212_s15 = sshll.u32 %s380_s18, 4  ;;  %p5367_p3 = scmp.ne.s32.totalorder %s5344_s23, 0  ;;  %s5267_s15 = int_to_ptr.vmem [resolvable:$true] %s3212_s15 }
 0x652   : > { %s4067_s26 = scalar_lea.vmem %s5267_s15, 128  ;;  %s4152_s29 = smov [#allocation9]  }
 0x653   : > { %p4068_p0 = scmp.ne.s32.totalorder %s5267_s15, %s4067_s26  ;;  %s4071_s27 = sshll.u32 %s4152_s29, 4  ;;  %s4072_s27 = int_to_ptr.vmem [resolvable:$false] %s4071_s27 }
 0x654   : > { %s4073_s19 = scalar_lea.vmem %s4072_s27, 256  ;;  %p4074_p8 = scmp.lt.s32.totalorder %s5267_s15, %s4072_s27 }
 0x655   : > { %p4069_p4 = pnand %p4068_p0, %p5367_p3  ;;  %p4075_p12 = scmp.lt.s32.totalorder %s4073_s19, %s4067_s26 }
 0x657   : > { %p4070_p7 = pneg %p4069_p4  ;;  %p4076_p2 = por %p4075_p12, %p4074_p8 }
 0x659   : > { %p4077_p5 = pnand %p4076_p2, %p4070_p7 }
 0x714   : > { %v3521_v17 = vpop.f32.mrb[8].mxu0 }
 0x715   : > { %v3522_v11 = vpop.f32.mrb[9].mxu0 }
 0x716   : > { %v3523_v35 = vadd.f32 %v3522_v11, %v3521_v17  ;;  %v3524_v39 = vpop.f32.mrb[10].mxu0 }
 0x717   : > { %v3525_v49 = vpop.f32.mrb[11].mxu0 }
 0x718   : > { %v3171_v8 = vadd.f32 %v3523_v35, %v3471_v15  ;;  %v3526_v30 = vadd.f32 %v3525_v49, %v3524_v39 }
 0x71a   : > { %v3174_v63 = vadd.f32 %v3526_v30, %v3471_v15  ;;  %3949 = vtanh.f32 %v3171_v8 }
 0x71c   : > { %3951 = vtanh.f32 %v3174_v63 }
 0x724   : > { %v3950_v10 = vpop.eup %3949 }
 0x726   : > { %v3952_v38 = vpop.eup %3951 }
 0x727   : > { %v3503_v25 = vpack.c.bf16 %v3952_v38, %v3950_v10 }
 0x729   : > { %3504 = vst [vmem:[%s380_s18] sm:$0xff] %v3503_v25  }
 0x72a   : > { %4080 = shalt.err (!%p4077_p5)
}
 0x72b   : > { %s4081_s24 = scalar_lea.hbm %s5265_s20, 128  ;;  %s4085_s28 = scalar_lea.hbm %s5327_s9, 512 }
 0x72c   : > { %p4082_p1 = scmp.ne.s32.totalorder %s5265_s20, %s4081_s24  ;;  %p4086_p13 = scmp.lt.u32.totalorder %s5265_s20, %s5327_s9 }
 0x72d   : > { %p4087_p10 = scmp.lt.u32.totalorder %s4085_s28, %s4081_s24  ;;  %p4089_p0 = scmp.lt.u32.totalorder %s4081_s24, %s5265_s20 }
 0x72e   : > { %p4083_p6 = pnand %p4082_p1, %p5367_p3 }
 0x72f   : > { %p4088_p11 = por %p4087_p10, %p4086_p13 }
 0x730   : > { %p4084_p9 = pneg %p4083_p6 }
 0x731   : > { %p4090_p4 = por %p4089_p0, %p4088_p11 }
 0x733   : > { %p4091_p7 = pnand %p4090_p4, %p4084_p9 }
 0x735   : > { %4094 = shalt.err (!%p4091_p7)
}
 0x736   : > { %s4153_s12 = smov 64   ;;  %s4154_s22 = smov 4  }
 0x737   : > { %3535 = dma.vmem_to_hbm [thread:$0]  (%p5367_p3), %s5267_s15, 128, %s5265_s20, %s5273_s21, %s4153_s12, %s4153_s12, %s4154_s22  }
 0x738   : > { %p5368_p8 = scmp.eq.s32.totalorder %s4231_s17, 3 }
 0x73a   : > { %4120 = dma.done.wait (%p5368_p8), [#allocation11], 512   ;;  %p5369_p12 = pmov %p5368_p8 }
 0x73c   : > { %4122 = vsyncadd (%p5369_p12), [#allocation11], 4294966784 }
 0x73d PF: > { %s5370_s26 = sld [smem:[#allocation19_spill]]  ;;  %p3558_p2 = scmp.ge.s32.totalorder %s4141_s16, 2 }
 0x73e   : > { %s3244_s29 = sand.u32 1, %s4129_s13  }
 0x73f   : > { %s3245_s27 = scalar_lea.sflag [#allocation6], %s3244_s29 }
 0x743   : > { %p5371_p5 = scmp.ne.s32.totalorder %s5370_s26, 0 }
 0x745   : > { %p3549_p1 = pnand %p3558_p2, %p5371_p5 }
 0x747   : > { %4124 = dma.done.wait (!%p3549_p1), %s3245_s27, 128  }
 0x748   : > { %4126 = vsyncadd (!%p3549_p1), %s3245_s27, 4294967168  ;;  %s5372_s16 = sld [smem:[#allocation17_spill]]  ;;  %s5373_s23 = sld [smem:[#allocation16_spill]] }
 0x749   : > { %s5374_s15 = sld [smem:[#allocation18_spill]]  ;;  %s5375_s13 = smov %s4133_s14 }
 0x74e   : > { %p24_p3 = scmp.ge.s32.totalorder %s5372_s16, 6   ;;  %s5376_s14 = smov %s5373_s23 }
 0x750   :  { %26 = sbr.rel (!%p24_p3) target bundleno = 6 (0x6), region = 114 }
 0x757   :  { %3250 = vsyncpa [#allocation5], 1 }
 0x758   :  { %3252 = vsyncpa [#allocation5 + $0x1], 1 }
 0x759   :  { %3253 = vsyncpa [#allocation8], 1 }
 0x75a   :  { %3254 = vsyncpa [#allocation6], 1 }
 0x75b   :  { %3256 = vsyncpa [#allocation6 + $0x1], 1 }
 0x75c   :  { %3257 = vsyncpa [#allocation11], 1 }

</bundles_post_ra>
